<compile_context>
chip_gen: v6e
topology: v6e:2x2x1
jax: 0.10.0
libtpu: 0.0.40
codegen_flags: <defaults>
</compile_context>

<pallas_src>
import functools

import jax
import jax.numpy as jnp
from jax.experimental import pallas as pl
from jax.experimental.pallas import tpu as pltpu

# ----------------------------- small BERT config -----------------------------
VOCAB_SIZE = 100
TYPE_VOCAB_SIZE = 2
MAX_POS = 16
HIDDEN = 32          # bert-base: 768
NUM_HEADS = 4        # bert-base: 12
HEAD_DIM = HIDDEN // NUM_HEADS
INTERMEDIATE = 64    # bert-base: 3072
NUM_LAYERS = 2       # bert-base: 12
LN_EPS = 1e-12

NUM_LABELS = 3       # neutral / boredom / engagement
NUM_CLASSES = 5      # rating classes per label (synthetic choice)
LOGIT_PAD = 128      # lane-dense padded classifier width

BATCH = 2
SEQ = 8


# ----------------------------- kernel helpers --------------------------------
def _layer_norm(x, gamma, beta, eps=LN_EPS):
    mu = jnp.mean(x, axis=-1, keepdims=True)
    var = jnp.mean((x - mu) ** 2, axis=-1, keepdims=True)
    return (x - mu) * jax.lax.rsqrt(var + eps) * gamma + beta


def _dense(v, w_bf16, b_f32):
    # bf16 MXU operands, f32 accumulation; bias add stays in f32.
    return jnp.dot(v.astype(jnp.bfloat16), w_bf16,
                   preferred_element_type=jnp.float32) + b_f32


def _split_heads(t, n_heads, head_dim):
    # (N, H) f32 -> (n_heads, N, head_dim) bf16.  One-shot split: the per-head
    # lane extract happens exactly once per tensor, everything downstream is a
    # single batched einsum over the leading head axis.
    return jnp.stack(
        [t[:, h * head_dim:(h + 1) * head_dim] for h in range(n_heads)],
        axis=0).astype(jnp.bfloat16)


# ----------------------------- the fused kernel -------------------------------
def emotion_bert_kernel(emb_ref, mask_ref,
                        emb_g_ref, emb_b_ref,
                        wq_ref, bq_ref, wk_ref, bk_ref, wv_ref, bv_ref,
                        wo_ref, bo_ref, ln1g_ref, ln1b_ref,
                        wi_ref, bi_ref, wf_ref, bf_ref, ln2g_ref, ln2b_ref,
                        pool_w_ref, pool_b_ref, cls_w_ref, cls_b_ref,
                        out_ref, *, n_heads, head_dim, n_layers):
    bf16 = jnp.bfloat16

    # embedding LayerNorm (f32)
    x = _layer_norm(emb_ref[...], emb_g_ref[...], emb_b_ref[...])   # (N=B*S, H)
    mask = mask_ref[...]                                            # (N, N) additive f32

    for l in range(n_layers):
        # ---- Q/K/V: three full-width matmuls (no lane-slicing of a fused 3H tensor) ----
        q = _dense(x, wq_ref[l], bq_ref[l])          # scale folded into wq at init
        k = _dense(x, wk_ref[l], bk_ref[l])
        v = _dense(x, wv_ref[l], bv_ref[l])

        qh = _split_heads(q, n_heads, head_dim)      # (nH, N, hd) bf16
        kh = _split_heads(k, n_heads, head_dim)
        vh = _split_heads(v, n_heads, head_dim)

        # ---- single batched scores / softmax / context over ALL heads ----
        s = jnp.einsum('hqd,hkd->hqk', qh, kh,
                       preferred_element_type=jnp.float32)          # (nH, N, N) f32
        s = s + mask                                                 # block-diag batch + padding mask
        m = jnp.max(s, axis=-1, keepdims=True)
        e = jnp.exp(s - m)
        p = e * pl.reciprocal(jnp.sum(e, axis=-1, keepdims=True), approx=True)
        ctx = jnp.einsum('hqk,hkd->hqd', p.astype(bf16), vh,
                         preferred_element_type=jnp.float32)         # (nH, N, hd) f32

        # ---- merge heads (single minor-axis concat) + ONE output projection ----
        ctx_m = jnp.concatenate([ctx[h] for h in range(n_heads)], axis=-1)   # (N, H)
        attn = _dense(ctx_m, wo_ref[l], bo_ref[l])

        # ---- residual + LayerNorm, FFN, residual + LayerNorm (all f32 elementwise) ----
        x1 = _layer_norm(attn + x, ln1g_ref[l], ln1b_ref[l])
        ff = _dense(x1, wi_ref[l], bi_ref[l])
        # TODO(synk): HF BERT uses exact erf GELU; tanh approximation kept for robust TPU lowering.
        ff = jax.nn.gelu(ff, approximate=True)
        ff = _dense(ff, wf_ref[l], bf_ref[l])
        x = _layer_norm(ff + x1, ln2g_ref[l], ln2b_ref[l])

    # ---- pooler + classifier on every row: same MXU cost, keeps the single
    #      output store fully sublane/lane dense.  Wrapper selects CLS rows. ----
    pooled = jnp.tanh(_dense(x, pool_w_ref[...], pool_b_ref[...]))   # (N, H)
    out_ref[...] = _dense(pooled, cls_w_ref[...], cls_b_ref[...])    # (N, 128)


# ----------------------------- parameters ------------------------------------
def init_params(key):
    def nxt():
        nonlocal key
        key, sub = jax.random.split(key)
        return sub

    def w(shape):
        return (0.02 * jax.random.normal(nxt(), shape)).astype(jnp.float32)

    zeros = lambda s: jnp.zeros(s, jnp.float32)
    ones = lambda s: jnp.ones(s, jnp.float32)

    scale = 1.0 / (float(HEAD_DIM) ** 0.5)

    wq, bq, wk, bk, wv, bv = [], [], [], [], [], []
    wo, bo, ln1g, ln1b = [], [], [], []
    wi, bi, wf, bf, ln2g, ln2b = [], [], [], [], [], []
    for _ in range(NUM_LAYERS):
        # 1/sqrt(head_dim) folded into the Q projection (bias is zero so only W needs it).
        wq.append(w((HIDDEN, HIDDEN)) * scale)
        bq.append(zeros((1, HIDDEN)))
        wk.append(w((HIDDEN, HIDDEN))); bk.append(zeros((1, HIDDEN)))
        wv.append(w((HIDDEN, HIDDEN))); bv.append(zeros((1, HIDDEN)))
        wo.append(w((HIDDEN, HIDDEN))); bo.append(zeros((1, HIDDEN)))
        ln1g.append(ones((1, HIDDEN))); ln1b.append(zeros((1, HIDDEN)))
        wi.append(w((HIDDEN, INTERMEDIATE))); bi.append(zeros((1, INTERMEDIATE)))
        wf.append(w((INTERMEDIATE, HIDDEN))); bf.append(zeros((1, HIDDEN)))
        ln2g.append(ones((1, HIDDEN))); ln2b.append(zeros((1, HIDDEN)))

    sb = lambda xs: jnp.stack(xs, axis=0).astype(jnp.bfloat16)   # MXU operands
    sf = lambda xs: jnp.stack(xs, axis=0)                        # f32 biases / LN

    cls_w = w((HIDDEN, NUM_LABELS * NUM_CLASSES))
    cls_b = zeros((1, NUM_LABELS * NUM_CLASSES))
    pad = LOGIT_PAD - NUM_LABELS * NUM_CLASSES
    cls_w_pad = jnp.pad(cls_w, ((0, 0), (0, pad)))
    cls_b_pad = jnp.pad(cls_b, ((0, 0), (0, pad)))

    return {
        "word_emb": w((VOCAB_SIZE, HIDDEN)),
        "pos_emb": w((MAX_POS, HIDDEN)),
        "type_emb": w((TYPE_VOCAB_SIZE, HIDDEN)),
        "emb_ln_g": ones((1, HIDDEN)), "emb_ln_b": zeros((1, HIDDEN)),
        "wq": sb(wq), "bq": sf(bq), "wk": sb(wk), "bk": sf(bk),
        "wv": sb(wv), "bv": sf(bv), "wo": sb(wo), "bo": sf(bo),
        "ln1_g": sf(ln1g), "ln1_b": sf(ln1b),
        "wi": sb(wi), "bi": sf(bi), "wf": sb(wf), "bf": sf(bf),
        "ln2_g": sf(ln2g), "ln2_b": sf(ln2b),
        "pooler_w": w((HIDDEN, HIDDEN)).astype(jnp.bfloat16),
        "pooler_b": zeros((1, HIDDEN)),
        "cls_w": cls_w_pad.astype(jnp.bfloat16),
        "cls_b": cls_b_pad,
    }


# ----------------------------- forward pass ----------------------------------
@jax.jit
def emotion_bert_forward(params, input_ids, attention_mask):
    B, S = input_ids.shape
    N = B * S

    # --- embeddings (gather glue in plain JAX) ---
    word = jnp.take(params["word_emb"], input_ids, axis=0)             # (B, S, H)
    pos = params["pos_emb"][:S][None, :, :]                            # (1, S, H)
    ttype = params["type_emb"][0][None, None, :]                       # token_type_ids == 0
    emb = (word + pos + ttype).reshape(N, HIDDEN).astype(jnp.float32)

    # Additive mask over the flattened (B*S) key axis: HF convention -10000 on
    # padded keys, plus -10000 on cross-batch pairs (block-diagonal).  Since
    # exp(-10000 - rowmax) underflows to exactly 0 in f32, this is numerically
    # identical to per-batch attention with the HF padding mask.
    bid = jnp.repeat(jnp.arange(B), S)                                  # (N,)
    same_batch = bid[:, None] == bid[None, :]
    key_valid = attention_mask.reshape(-1).astype(bool)[None, :]
    mask_add = jnp.where(same_batch & key_valid, 0.0, -10000.0).astype(jnp.float32)

    kernel = functools.partial(emotion_bert_kernel,
                               n_heads=NUM_HEADS, head_dim=HEAD_DIM,
                               n_layers=NUM_LAYERS)
    args = (emb, mask_add,
            params["emb_ln_g"], params["emb_ln_b"],
            params["wq"], params["bq"], params["wk"], params["bk"],
            params["wv"], params["bv"], params["wo"], params["bo"],
            params["ln1_g"], params["ln1_b"],
            params["wi"], params["bi"], params["wf"], params["bf"],
            params["ln2_g"], params["ln2_b"],
            params["pooler_w"], params["pooler_b"],
            params["cls_w"], params["cls_b"])

    logits_pad = pl.pallas_call(
        kernel,
        out_shape=jax.ShapeDtypeStruct((N, LOGIT_PAD), jnp.float32),
        in_specs=[pl.BlockSpec(memory_space=pltpu.MemorySpace.VMEM)] * len(args),
        out_specs=pl.BlockSpec(memory_space=pltpu.MemorySpace.VMEM),
    )(*args)

    # CLS rows = position 0 of each sequence; slice off the lane padding.
    logits = logits_pad.reshape(B, S, LOGIT_PAD)[:, 0, :NUM_LABELS * NUM_CLASSES]
    # logits.view(-1, NUM_LABELS, NUM_CLASSES)
    return logits.reshape(-1, NUM_LABELS, NUM_CLASSES)


# ----------------------------- main ------------------------------------------
if __name__ == "__main__":
    root = jax.random.PRNGKey(0)
    k_param, k_ids = jax.random.split(root)

    params = init_params(k_param)

    input_ids = jax.random.randint(k_ids, (BATCH, SEQ), 0, VOCAB_SIZE, dtype=jnp.int32)
    attention_mask = jnp.array(
        [[1, 1, 1, 1, 1, 1, 1, 1],
         [1, 1, 1, 1, 1, 0, 0, 0]], dtype=jnp.int32)

    logits = emotion_bert_forward(params, input_ids, attention_mask)
    jax.block_until_ready(logits)

    assert logits.shape == (BATCH, NUM_LABELS, NUM_CLASSES)
    assert logits.dtype == jnp.float32
    assert bool(jnp.all(jnp.isfinite(logits)))
    print("KERNEL_OK")
</pallas_src>

<mosaic_0001>
module attributes {stable_mosaic.version = 11 : i64} {
  func.func @emotion_bert_kernel(%arg0: memref<16x32xf32, #tpu.memory_space<vmem>>, %arg1: memref<16x16xf32, #tpu.memory_space<vmem>>, %arg2: memref<1x32xf32, #tpu.memory_space<vmem>>, %arg3: memref<1x32xf32, #tpu.memory_space<vmem>>, %arg4: memref<2x32x32xbf16, #tpu.memory_space<vmem>>, %arg5: memref<2x1x32xf32, #tpu.memory_space<vmem>>, %arg6: memref<2x32x32xbf16, #tpu.memory_space<vmem>>, %arg7: memref<2x1x32xf32, #tpu.memory_space<vmem>>, %arg8: memref<2x32x32xbf16, #tpu.memory_space<vmem>>, %arg9: memref<2x1x32xf32, #tpu.memory_space<vmem>>, %arg10: memref<2x32x32xbf16, #tpu.memory_space<vmem>>, %arg11: memref<2x1x32xf32, #tpu.memory_space<vmem>>, %arg12: memref<2x1x32xf32, #tpu.memory_space<vmem>>, %arg13: memref<2x1x32xf32, #tpu.memory_space<vmem>>, %arg14: memref<2x32x64xbf16, #tpu.memory_space<vmem>>, %arg15: memref<2x1x64xf32, #tpu.memory_space<vmem>>, %arg16: memref<2x64x32xbf16, #tpu.memory_space<vmem>>, %arg17: memref<2x1x32xf32, #tpu.memory_space<vmem>>, %arg18: memref<2x1x32xf32, #tpu.memory_space<vmem>>, %arg19: memref<2x1x32xf32, #tpu.memory_space<vmem>>, %arg20: memref<32x32xbf16, #tpu.memory_space<vmem>>, %arg21: memref<1x32xf32, #tpu.memory_space<vmem>>, %arg22: memref<32x128xbf16, #tpu.memory_space<vmem>>, %arg23: memref<1x128xf32, #tpu.memory_space<vmem>>, %arg24: memref<16x128xf32, #tpu.memory_space<vmem>>) attributes {dimension_semantics = [], scalar_prefetch = 0 : i64, scratch_operands = 0 : i64, tpu.core_type = #tpu.core_type<tc>} {
    %c0 = arith.constant 0 : index
    %c0_0 = arith.constant 0 : index
    %0 = vector.load %arg0[%c0, %c0_0] : memref<16x32xf32, #tpu.memory_space<vmem>>, vector<16x32xf32>
    %c0_1 = arith.constant 0 : index
    %c0_2 = arith.constant 0 : index
    %1 = vector.load %arg2[%c0_1, %c0_2] : memref<1x32xf32, #tpu.memory_space<vmem>>, vector<1x32xf32>
    %c0_3 = arith.constant 0 : index
    %c0_4 = arith.constant 0 : index
    %2 = vector.load %arg3[%c0_3, %c0_4] : memref<1x32xf32, #tpu.memory_space<vmem>>, vector<1x32xf32>
    %cst = arith.constant dense<0.000000e+00> : vector<16xf32>
    %3 = vector.multi_reduction <add>, %0, %cst [1] : vector<16x32xf32> to vector<16xf32>
    %4 = vector.shape_cast %3 : vector<16xf32> to vector<16x1xf32>
    %cst_5 = arith.constant 3.200000e+01 : f32
    %5 = vector.broadcast %cst_5 : f32 to vector<16x1xf32>
    %6 = arith.divf %4, %5 : vector<16x1xf32>
    %7 = vector.broadcast %6 : vector<16x1xf32> to vector<16x32xf32>
    %8 = arith.subf %0, %7 : vector<16x32xf32>
    %9 = arith.mulf %8, %8 : vector<16x32xf32>
    %cst_6 = arith.constant dense<0.000000e+00> : vector<16xf32>
    %10 = vector.multi_reduction <add>, %9, %cst_6 [1] : vector<16x32xf32> to vector<16xf32>
    %11 = vector.shape_cast %10 : vector<16xf32> to vector<16x1xf32>
    %cst_7 = arith.constant 3.200000e+01 : f32
    %12 = vector.broadcast %cst_7 : f32 to vector<16x1xf32>
    %13 = arith.divf %11, %12 : vector<16x1xf32>
    %14 = vector.broadcast %6 : vector<16x1xf32> to vector<16x32xf32>
    %15 = arith.subf %0, %14 : vector<16x32xf32>
    %cst_8 = arith.constant 9.99999996E-13 : f32
    %16 = vector.broadcast %cst_8 : f32 to vector<16x1xf32>
    %17 = arith.addf %13, %16 : vector<16x1xf32>
    %18 = math.rsqrt %17 : vector<16x1xf32>
    %19 = vector.broadcast %18 : vector<16x1xf32> to vector<16x32xf32>
    %20 = arith.mulf %15, %19 : vector<16x32xf32>
    %21 = vector.broadcast %1 : vector<1x32xf32> to vector<16x32xf32>
    %22 = arith.mulf %20, %21 : vector<16x32xf32>
    %23 = vector.broadcast %2 : vector<1x32xf32> to vector<16x32xf32>
    %24 = arith.addf %22, %23 : vector<16x32xf32>
    %c0_9 = arith.constant 0 : index
    %c0_10 = arith.constant 0 : index
    %25 = vector.load %arg1[%c0_9, %c0_10] : memref<16x16xf32, #tpu.memory_space<vmem>>, vector<16x16xf32>
    %c0_11 = arith.constant 0 : index
    %c0_12 = arith.constant 0 : index
    %c0_13 = arith.constant 0 : index
    %26 = vector.load %arg4[%c0_11, %c0_12, %c0_13] : memref<2x32x32xbf16, #tpu.memory_space<vmem>>, vector<1x32x32xbf16>
    %27 = vector.shape_cast %26 : vector<1x32x32xbf16> to vector<32x32xbf16>
    %c0_14 = arith.constant 0 : index
    %c0_15 = arith.constant 0 : index
    %c0_16 = arith.constant 0 : index
    %28 = vector.load %arg5[%c0_14, %c0_15, %c0_16] : memref<2x1x32xf32, #tpu.memory_space<vmem>>, vector<1x1x32xf32>
    %29 = vector.shape_cast %28 : vector<1x1x32xf32> to vector<1x32xf32>
    %30 = arith.truncf %24 : vector<16x32xf32> to vector<16x32xbf16>
    %cst_17 = arith.constant dense<0.000000e+00> : vector<16x32xf32>
    %31 = tpu.matmul %30, %27, %cst_17 {dimension_numbers = #tpu.dot_dimension_numbers<[1], [0], [0], [1], [0, 0, 1, 1], [], []>} : vector<16x32xbf16>, vector<32x32xbf16>, vector<16x32xf32> -> vector<16x32xf32>
    %32 = vector.broadcast %29 : vector<1x32xf32> to vector<16x32xf32>
    %33 = arith.addf %31, %32 : vector<16x32xf32>
    %c0_18 = arith.constant 0 : index
    %c0_19 = arith.constant 0 : index
    %c0_20 = arith.constant 0 : index
    %34 = vector.load %arg6[%c0_18, %c0_19, %c0_20] : memref<2x32x32xbf16, #tpu.memory_space<vmem>>, vector<1x32x32xbf16>
    %35 = vector.shape_cast %34 : vector<1x32x32xbf16> to vector<32x32xbf16>
    %c0_21 = arith.constant 0 : index
    %c0_22 = arith.constant 0 : index
    %c0_23 = arith.constant 0 : index
    %36 = vector.load %arg7[%c0_21, %c0_22, %c0_23] : memref<2x1x32xf32, #tpu.memory_space<vmem>>, vector<1x1x32xf32>
    %37 = vector.shape_cast %36 : vector<1x1x32xf32> to vector<1x32xf32>
    %38 = arith.truncf %24 : vector<16x32xf32> to vector<16x32xbf16>
    %cst_24 = arith.constant dense<0.000000e+00> : vector<16x32xf32>
    %39 = tpu.matmul %38, %35, %cst_24 {dimension_numbers = #tpu.dot_dimension_numbers<[1], [0], [0], [1], [0, 0, 1, 1], [], []>} : vector<16x32xbf16>, vector<32x32xbf16>, vector<16x32xf32> -> vector<16x32xf32>
    %40 = vector.broadcast %37 : vector<1x32xf32> to vector<16x32xf32>
    %41 = arith.addf %39, %40 : vector<16x32xf32>
    %c0_25 = arith.constant 0 : index
    %c0_26 = arith.constant 0 : index
    %c0_27 = arith.constant 0 : index
    %42 = vector.load %arg8[%c0_25, %c0_26, %c0_27] : memref<2x32x32xbf16, #tpu.memory_space<vmem>>, vector<1x32x32xbf16>
    %43 = vector.shape_cast %42 : vector<1x32x32xbf16> to vector<32x32xbf16>
    %c0_28 = arith.constant 0 : index
    %c0_29 = arith.constant 0 : index
    %c0_30 = arith.constant 0 : index
    %44 = vector.load %arg9[%c0_28, %c0_29, %c0_30] : memref<2x1x32xf32, #tpu.memory_space<vmem>>, vector<1x1x32xf32>
    %45 = vector.shape_cast %44 : vector<1x1x32xf32> to vector<1x32xf32>
    %46 = arith.truncf %24 : vector<16x32xf32> to vector<16x32xbf16>
    %cst_31 = arith.constant dense<0.000000e+00> : vector<16x32xf32>
    %47 = tpu.matmul %46, %43, %cst_31 {dimension_numbers = #tpu.dot_dimension_numbers<[1], [0], [0], [1], [0, 0, 1, 1], [], []>} : vector<16x32xbf16>, vector<32x32xbf16>, vector<16x32xf32> -> vector<16x32xf32>
    %48 = vector.broadcast %45 : vector<1x32xf32> to vector<16x32xf32>
    %49 = arith.addf %47, %48 : vector<16x32xf32>
    %50 = vector.extract_strided_slice %33 {offsets = [0, 0], sizes = [16, 8], strides = [1, 1]} : vector<16x32xf32> to vector<16x8xf32>
    %51 = vector.extract_strided_slice %33 {offsets = [0, 8], sizes = [16, 8], strides = [1, 1]} : vector<16x32xf32> to vector<16x8xf32>
    %52 = vector.extract_strided_slice %33 {offsets = [0, 16], sizes = [16, 8], strides = [1, 1]} : vector<16x32xf32> to vector<16x8xf32>
    %53 = vector.extract_strided_slice %33 {offsets = [0, 24], sizes = [16, 8], strides = [1, 1]} : vector<16x32xf32> to vector<16x8xf32>
    %54 = vector.shape_cast %50 : vector<16x8xf32> to vector<1x16x8xf32>
    %55 = vector.shape_cast %51 : vector<16x8xf32> to vector<1x16x8xf32>
    %56 = vector.shape_cast %52 : vector<16x8xf32> to vector<1x16x8xf32>
    %57 = vector.shape_cast %53 : vector<16x8xf32> to vector<1x16x8xf32>
    %58 = tpu.concatenate %54, %55, %56, %57 in 0 : vector<1x16x8xf32>, vector<1x16x8xf32>, vector<1x16x8xf32>, vector<1x16x8xf32> -> vector<4x16x8xf32>
    %59 = arith.truncf %58 : vector<4x16x8xf32> to vector<4x16x8xbf16>
    %60 = vector.extract_strided_slice %41 {offsets = [0, 0], sizes = [16, 8], strides = [1, 1]} : vector<16x32xf32> to vector<16x8xf32>
    %61 = vector.extract_strided_slice %41 {offsets = [0, 8], sizes = [16, 8], strides = [1, 1]} : vector<16x32xf32> to vector<16x8xf32>
    %62 = vector.extract_strided_slice %41 {offsets = [0, 16], sizes = [16, 8], strides = [1, 1]} : vector<16x32xf32> to vector<16x8xf32>
    %63 = vector.extract_strided_slice %41 {offsets = [0, 24], sizes = [16, 8], strides = [1, 1]} : vector<16x32xf32> to vector<16x8xf32>
    %64 = vector.shape_cast %60 : vector<16x8xf32> to vector<1x16x8xf32>
    %65 = vector.shape_cast %61 : vector<16x8xf32> to vector<1x16x8xf32>
    %66 = vector.shape_cast %62 : vector<16x8xf32> to vector<1x16x8xf32>
    %67 = vector.shape_cast %63 : vector<16x8xf32> to vector<1x16x8xf32>
    %68 = tpu.concatenate %64, %65, %66, %67 in 0 : vector<1x16x8xf32>, vector<1x16x8xf32>, vector<1x16x8xf32>, vector<1x16x8xf32> -> vector<4x16x8xf32>
    %69 = arith.truncf %68 : vector<4x16x8xf32> to vector<4x16x8xbf16>
    %70 = vector.extract_strided_slice %49 {offsets = [0, 0], sizes = [16, 8], strides = [1, 1]} : vector<16x32xf32> to vector<16x8xf32>
    %71 = vector.extract_strided_slice %49 {offsets = [0, 8], sizes = [16, 8], strides = [1, 1]} : vector<16x32xf32> to vector<16x8xf32>
    %72 = vector.extract_strided_slice %49 {offsets = [0, 16], sizes = [16, 8], strides = [1, 1]} : vector<16x32xf32> to vector<16x8xf32>
    %73 = vector.extract_strided_slice %49 {offsets = [0, 24], sizes = [16, 8], strides = [1, 1]} : vector<16x32xf32> to vector<16x8xf32>
    %74 = vector.shape_cast %70 : vector<16x8xf32> to vector<1x16x8xf32>
    %75 = vector.shape_cast %71 : vector<16x8xf32> to vector<1x16x8xf32>
    %76 = vector.shape_cast %72 : vector<16x8xf32> to vector<1x16x8xf32>
    %77 = vector.shape_cast %73 : vector<16x8xf32> to vector<1x16x8xf32>
    %78 = tpu.concatenate %74, %75, %76, %77 in 0 : vector<1x16x8xf32>, vector<1x16x8xf32>, vector<1x16x8xf32>, vector<1x16x8xf32> -> vector<4x16x8xf32>
    %79 = arith.truncf %78 : vector<4x16x8xf32> to vector<4x16x8xbf16>
    "tpu.trace_start"() <{level = 10 : i32, message = "hqd,hkd->hqk"}> : () -> ()
    %cst_32 = arith.constant dense<0.000000e+00> : vector<4x16x16xf32>
    %80 = tpu.matmul %59, %69, %cst_32 {dimension_numbers = #tpu.dot_dimension_numbers<[2], [2], [1], [1], [0, 0, 0, 1, 1, 1], [0], [0]>} : vector<4x16x8xbf16>, vector<4x16x8xbf16>, vector<4x16x16xf32> -> vector<4x16x16xf32>
    "tpu.trace_stop"() : () -> ()
    %81 = vector.shape_cast %25 : vector<16x16xf32> to vector<1x16x16xf32>
    %82 = vector.broadcast %81 : vector<1x16x16xf32> to vector<4x16x16xf32>
    %83 = arith.addf %80, %82 : vector<4x16x16xf32>
    %cst_33 = arith.constant dense<0xFF800000> : vector<4x16xf32>
    %84 = vector.multi_reduction <maximumf>, %83, %cst_33 [2] : vector<4x16x16xf32> to vector<4x16xf32>
    %85 = vector.shape_cast %84 : vector<4x16xf32> to vector<4x16x1xf32>
    %86 = vector.broadcast %85 : vector<4x16x1xf32> to vector<4x16x16xf32>
    %87 = arith.subf %83, %86 : vector<4x16x16xf32>
    %88 = math.exp %87 : vector<4x16x16xf32>
    %cst_34 = arith.constant dense<0.000000e+00> : vector<4x16xf32>
    %89 = vector.multi_reduction <add>, %88, %cst_34 [2] : vector<4x16x16xf32> to vector<4x16xf32>
    %90 = vector.shape_cast %89 : vector<4x16xf32> to vector<4x16x1xf32>
    %91 = tpu.reciprocal %90 {approx = true} : vector<4x16x1xf32> -> vector<4x16x1xf32>
    %92 = vector.broadcast %91 : vector<4x16x1xf32> to vector<4x16x16xf32>
    %93 = arith.mulf %88, %92 : vector<4x16x16xf32>
    %94 = arith.truncf %93 : vector<4x16x16xf32> to vector<4x16x16xbf16>
    "tpu.trace_start"() <{level = 10 : i32, message = "hqk,hkd->hqd"}> : () -> ()
    %cst_35 = arith.constant dense<0.000000e+00> : vector<4x16x8xf32>
    %95 = tpu.matmul %94, %79, %cst_35 {dimension_numbers = #tpu.dot_dimension_numbers<[2], [1], [1], [2], [0, 0, 0, 1, 1, 2], [0], [0]>} : vector<4x16x16xbf16>, vector<4x16x8xbf16>, vector<4x16x8xf32> -> vector<4x16x8xf32>
    "tpu.trace_stop"() : () -> ()
    %96 = vector.extract_strided_slice %95 {offsets = [0, 0, 0], sizes = [1, 16, 8], strides = [1, 1, 1]} : vector<4x16x8xf32> to vector<1x16x8xf32>
    %97 = vector.shape_cast %96 : vector<1x16x8xf32> to vector<16x8xf32>
    %98 = vector.extract_strided_slice %95 {offsets = [1, 0, 0], sizes = [1, 16, 8], strides = [1, 1, 1]} : vector<4x16x8xf32> to vector<1x16x8xf32>
    %99 = vector.shape_cast %98 : vector<1x16x8xf32> to vector<16x8xf32>
    %100 = vector.extract_strided_slice %95 {offsets = [2, 0, 0], sizes = [1, 16, 8], strides = [1, 1, 1]} : vector<4x16x8xf32> to vector<1x16x8xf32>
    %101 = vector.shape_cast %100 : vector<1x16x8xf32> to vector<16x8xf32>
    %102 = vector.extract_strided_slice %95 {offsets = [3, 0, 0], sizes = [1, 16, 8], strides = [1, 1, 1]} : vector<4x16x8xf32> to vector<1x16x8xf32>
    %103 = vector.shape_cast %102 : vector<1x16x8xf32> to vector<16x8xf32>
    %104 = tpu.concatenate %97, %99, %101, %103 in 1 : vector<16x8xf32>, vector<16x8xf32>, vector<16x8xf32>, vector<16x8xf32> -> vector<16x32xf32>
    %c0_36 = arith.constant 0 : index
    %c0_37 = arith.constant 0 : index
    %c0_38 = arith.constant 0 : index
    %105 = vector.load %arg10[%c0_36, %c0_37, %c0_38] : memref<2x32x32xbf16, #tpu.memory_space<vmem>>, vector<1x32x32xbf16>
    %106 = vector.shape_cast %105 : vector<1x32x32xbf16> to vector<32x32xbf16>
    %c0_39 = arith.constant 0 : index
    %c0_40 = arith.constant 0 : index
    %c0_41 = arith.constant 0 : index
    %107 = vector.load %arg11[%c0_39, %c0_40, %c0_41] : memref<2x1x32xf32, #tpu.memory_space<vmem>>, vector<1x1x32xf32>
    %108 = vector.shape_cast %107 : vector<1x1x32xf32> to vector<1x32xf32>
    %109 = arith.truncf %104 : vector<16x32xf32> to vector<16x32xbf16>
    %cst_42 = arith.constant dense<0.000000e+00> : vector<16x32xf32>
    %110 = tpu.matmul %109, %106, %cst_42 {dimension_numbers = #tpu.dot_dimension_numbers<[1], [0], [0], [1], [0, 0, 1, 1], [], []>} : vector<16x32xbf16>, vector<32x32xbf16>, vector<16x32xf32> -> vector<16x32xf32>
    %111 = vector.broadcast %108 : vector<1x32xf32> to vector<16x32xf32>
    %112 = arith.addf %110, %111 : vector<16x32xf32>
    %113 = arith.addf %112, %24 : vector<16x32xf32>
    %c0_43 = arith.constant 0 : index
    %c0_44 = arith.constant 0 : index
    %c0_45 = arith.constant 0 : index
    %114 = vector.load %arg12[%c0_43, %c0_44, %c0_45] : memref<2x1x32xf32, #tpu.memory_space<vmem>>, vector<1x1x32xf32>
    %115 = vector.shape_cast %114 : vector<1x1x32xf32> to vector<1x32xf32>
    %c0_46 = arith.constant 0 : index
    %c0_47 = arith.constant 0 : index
    %c0_48 = arith.constant 0 : index
    %116 = vector.load %arg13[%c0_46, %c0_47, %c0_48] : memref<2x1x32xf32, #tpu.memory_space<vmem>>, vector<1x1x32xf32>
    %117 = vector.shape_cast %116 : vector<1x1x32xf32> to vector<1x32xf32>
    %cst_49 = arith.constant dense<0.000000e+00> : vector<16xf32>
    %118 = vector.multi_reduction <add>, %113, %cst_49 [1] : vector<16x32xf32> to vector<16xf32>
    %119 = vector.shape_cast %118 : vector<16xf32> to vector<16x1xf32>
    %cst_50 = arith.constant 3.200000e+01 : f32
    %120 = vector.broadcast %cst_50 : f32 to vector<16x1xf32>
    %121 = arith.divf %119, %120 : vector<16x1xf32>
    %122 = vector.broadcast %121 : vector<16x1xf32> to vector<16x32xf32>
    %123 = arith.subf %113, %122 : vector<16x32xf32>
    %124 = arith.mulf %123, %123 : vector<16x32xf32>
    %cst_51 = arith.constant dense<0.000000e+00> : vector<16xf32>
    %125 = vector.multi_reduction <add>, %124, %cst_51 [1] : vector<16x32xf32> to vector<16xf32>
    %126 = vector.shape_cast %125 : vector<16xf32> to vector<16x1xf32>
    %cst_52 = arith.constant 3.200000e+01 : f32
    %127 = vector.broadcast %cst_52 : f32 to vector<16x1xf32>
    %128 = arith.divf %126, %127 : vector<16x1xf32>
    %129 = vector.broadcast %121 : vector<16x1xf32> to vector<16x32xf32>
    %130 = arith.subf %113, %129 : vector<16x32xf32>
    %cst_53 = arith.constant 9.99999996E-13 : f32
    %131 = vector.broadcast %cst_53 : f32 to vector<16x1xf32>
    %132 = arith.addf %128, %131 : vector<16x1xf32>
    %133 = math.rsqrt %132 : vector<16x1xf32>
    %134 = vector.broadcast %133 : vector<16x1xf32> to vector<16x32xf32>
    %135 = arith.mulf %130, %134 : vector<16x32xf32>
    %136 = vector.broadcast %115 : vector<1x32xf32> to vector<16x32xf32>
    %137 = arith.mulf %135, %136 : vector<16x32xf32>
    %138 = vector.broadcast %117 : vector<1x32xf32> to vector<16x32xf32>
    %139 = arith.addf %137, %138 : vector<16x32xf32>
    %c0_54 = arith.constant 0 : index
    %c0_55 = arith.constant 0 : index
    %c0_56 = arith.constant 0 : index
    %140 = vector.load %arg14[%c0_54, %c0_55, %c0_56] : memref<2x32x64xbf16, #tpu.memory_space<vmem>>, vector<1x32x64xbf16>
    %141 = vector.shape_cast %140 : vector<1x32x64xbf16> to vector<32x64xbf16>
    %c0_57 = arith.constant 0 : index
    %c0_58 = arith.constant 0 : index
    %c0_59 = arith.constant 0 : index
    %142 = vector.load %arg15[%c0_57, %c0_58, %c0_59] : memref<2x1x64xf32, #tpu.memory_space<vmem>>, vector<1x1x64xf32>
    %143 = vector.shape_cast %142 : vector<1x1x64xf32> to vector<1x64xf32>
    %144 = arith.truncf %139 : vector<16x32xf32> to vector<16x32xbf16>
    %cst_60 = arith.constant dense<0.000000e+00> : vector<16x64xf32>
    %145 = tpu.matmul %144, %141, %cst_60 {dimension_numbers = #tpu.dot_dimension_numbers<[1], [0], [0], [1], [0, 0, 1, 1], [], []>} : vector<16x32xbf16>, vector<32x64xbf16>, vector<16x64xf32> -> vector<16x64xf32>
    %146 = vector.broadcast %143 : vector<1x64xf32> to vector<16x64xf32>
    %147 = arith.addf %145, %146 : vector<16x64xf32>
    %148 = arith.mulf %147, %147 : vector<16x64xf32>
    %149 = arith.mulf %147, %148 : vector<16x64xf32>
    %cst_61 = arith.constant 4.471500e-02 : f32
    %150 = vector.broadcast %cst_61 : f32 to vector<16x64xf32>
    %151 = arith.mulf %150, %149 : vector<16x64xf32>
    %152 = arith.addf %147, %151 : vector<16x64xf32>
    %cst_62 = arith.constant 0.797884583 : f32
    %153 = vector.broadcast %cst_62 : f32 to vector<16x64xf32>
    %154 = arith.mulf %153, %152 : vector<16x64xf32>
    %155 = math.tanh %154 : vector<16x64xf32>
    %cst_63 = arith.constant 1.000000e+00 : f32
    %156 = vector.broadcast %cst_63 : f32 to vector<16x64xf32>
    %157 = arith.addf %156, %155 : vector<16x64xf32>
    %cst_64 = arith.constant 5.000000e-01 : f32
    %158 = vector.broadcast %cst_64 : f32 to vector<16x64xf32>
    %159 = arith.mulf %158, %157 : vector<16x64xf32>
    %160 = arith.mulf %147, %159 : vector<16x64xf32>
    %c0_65 = arith.constant 0 : index
    %c0_66 = arith.constant 0 : index
    %c0_67 = arith.constant 0 : index
    %161 = vector.load %arg16[%c0_65, %c0_66, %c0_67] : memref<2x64x32xbf16, #tpu.memory_space<vmem>>, vector<1x64x32xbf16>
    %162 = vector.shape_cast %161 : vector<1x64x32xbf16> to vector<64x32xbf16>
    %c0_68 = arith.constant 0 : index
    %c0_69 = arith.constant 0 : index
    %c0_70 = arith.constant 0 : index
    %163 = vector.load %arg17[%c0_68, %c0_69, %c0_70] : memref<2x1x32xf32, #tpu.memory_space<vmem>>, vector<1x1x32xf32>
    %164 = vector.shape_cast %163 : vector<1x1x32xf32> to vector<1x32xf32>
    %165 = arith.truncf %160 : vector<16x64xf32> to vector<16x64xbf16>
    %cst_71 = arith.constant dense<0.000000e+00> : vector<16x32xf32>
    %166 = tpu.matmul %165, %162, %cst_71 {dimension_numbers = #tpu.dot_dimension_numbers<[1], [0], [0], [1], [0, 0, 1, 1], [], []>} : vector<16x64xbf16>, vector<64x32xbf16>, vector<16x32xf32> -> vector<16x32xf32>
    %167 = vector.broadcast %164 : vector<1x32xf32> to vector<16x32xf32>
    %168 = arith.addf %166, %167 : vector<16x32xf32>
    %169 = arith.addf %168, %139 : vector<16x32xf32>
    %c0_72 = arith.constant 0 : index
    %c0_73 = arith.constant 0 : index
    %c0_74 = arith.constant 0 : index
    %170 = vector.load %arg18[%c0_72, %c0_73, %c0_74] : memref<2x1x32xf32, #tpu.memory_space<vmem>>, vector<1x1x32xf32>
    %171 = vector.shape_cast %170 : vector<1x1x32xf32> to vector<1x32xf32>
    %c0_75 = arith.constant 0 : index
    %c0_76 = arith.constant 0 : index
    %c0_77 = arith.constant 0 : index
    %172 = vector.load %arg19[%c0_75, %c0_76, %c0_77] : memref<2x1x32xf32, #tpu.memory_space<vmem>>, vector<1x1x32xf32>
    %173 = vector.shape_cast %172 : vector<1x1x32xf32> to vector<1x32xf32>
    %cst_78 = arith.constant dense<0.000000e+00> : vector<16xf32>
    %174 = vector.multi_reduction <add>, %169, %cst_78 [1] : vector<16x32xf32> to vector<16xf32>
    %175 = vector.shape_cast %174 : vector<16xf32> to vector<16x1xf32>
    %cst_79 = arith.constant 3.200000e+01 : f32
    %176 = vector.broadcast %cst_79 : f32 to vector<16x1xf32>
    %177 = arith.divf %175, %176 : vector<16x1xf32>
    %178 = vector.broadcast %177 : vector<16x1xf32> to vector<16x32xf32>
    %179 = arith.subf %169, %178 : vector<16x32xf32>
    %180 = arith.mulf %179, %179 : vector<16x32xf32>
    %cst_80 = arith.constant dense<0.000000e+00> : vector<16xf32>
    %181 = vector.multi_reduction <add>, %180, %cst_80 [1] : vector<16x32xf32> to vector<16xf32>
    %182 = vector.shape_cast %181 : vector<16xf32> to vector<16x1xf32>
    %cst_81 = arith.constant 3.200000e+01 : f32
    %183 = vector.broadcast %cst_81 : f32 to vector<16x1xf32>
    %184 = arith.divf %182, %183 : vector<16x1xf32>
    %185 = vector.broadcast %177 : vector<16x1xf32> to vector<16x32xf32>
    %186 = arith.subf %169, %185 : vector<16x32xf32>
    %cst_82 = arith.constant 9.99999996E-13 : f32
    %187 = vector.broadcast %cst_82 : f32 to vector<16x1xf32>
    %188 = arith.addf %184, %187 : vector<16x1xf32>
    %189 = math.rsqrt %188 : vector<16x1xf32>
    %190 = vector.broadcast %189 : vector<16x1xf32> to vector<16x32xf32>
    %191 = arith.mulf %186, %190 : vector<16x32xf32>
    %192 = vector.broadcast %171 : vector<1x32xf32> to vector<16x32xf32>
    %193 = arith.mulf %191, %192 : vector<16x32xf32>
    %194 = vector.broadcast %173 : vector<1x32xf32> to vector<16x32xf32>
    %195 = arith.addf %193, %194 : vector<16x32xf32>
    %c1 = arith.constant 1 : index
    %c0_83 = arith.constant 0 : index
    %c0_84 = arith.constant 0 : index
    %196 = vector.load %arg4[%c1, %c0_83, %c0_84] : memref<2x32x32xbf16, #tpu.memory_space<vmem>>, vector<1x32x32xbf16>
    %197 = vector.shape_cast %196 : vector<1x32x32xbf16> to vector<32x32xbf16>
    %c1_85 = arith.constant 1 : index
    %c0_86 = arith.constant 0 : index
    %c0_87 = arith.constant 0 : index
    %198 = vector.load %arg5[%c1_85, %c0_86, %c0_87] : memref<2x1x32xf32, #tpu.memory_space<vmem>>, vector<1x1x32xf32>
    %199 = vector.shape_cast %198 : vector<1x1x32xf32> to vector<1x32xf32>
    %200 = arith.truncf %195 : vector<16x32xf32> to vector<16x32xbf16>
    %cst_88 = arith.constant dense<0.000000e+00> : vector<16x32xf32>
    %201 = tpu.matmul %200, %197, %cst_88 {dimension_numbers = #tpu.dot_dimension_numbers<[1], [0], [0], [1], [0, 0, 1, 1], [], []>} : vector<16x32xbf16>, vector<32x32xbf16>, vector<16x32xf32> -> vector<16x32xf32>
    %202 = vector.broadcast %199 : vector<1x32xf32> to vector<16x32xf32>
    %203 = arith.addf %201, %202 : vector<16x32xf32>
    %c1_89 = arith.constant 1 : index
    %c0_90 = arith.constant 0 : index
    %c0_91 = arith.constant 0 : index
    %204 = vector.load %arg6[%c1_89, %c0_90, %c0_91] : memref<2x32x32xbf16, #tpu.memory_space<vmem>>, vector<1x32x32xbf16>
    %205 = vector.shape_cast %204 : vector<1x32x32xbf16> to vector<32x32xbf16>
    %c1_92 = arith.constant 1 : index
    %c0_93 = arith.constant 0 : index
    %c0_94 = arith.constant 0 : index
    %206 = vector.load %arg7[%c1_92, %c0_93, %c0_94] : memref<2x1x32xf32, #tpu.memory_space<vmem>>, vector<1x1x32xf32>
    %207 = vector.shape_cast %206 : vector<1x1x32xf32> to vector<1x32xf32>
    %208 = arith.truncf %195 : vector<16x32xf32> to vector<16x32xbf16>
    %cst_95 = arith.constant dense<0.000000e+00> : vector<16x32xf32>
    %209 = tpu.matmul %208, %205, %cst_95 {dimension_numbers = #tpu.dot_dimension_numbers<[1], [0], [0], [1], [0, 0, 1, 1], [], []>} : vector<16x32xbf16>, vector<32x32xbf16>, vector<16x32xf32> -> vector<16x32xf32>
    %210 = vector.broadcast %207 : vector<1x32xf32> to vector<16x32xf32>
    %211 = arith.addf %209, %210 : vector<16x32xf32>
    %c1_96 = arith.constant 1 : index
    %c0_97 = arith.constant 0 : index
    %c0_98 = arith.constant 0 : index
    %212 = vector.load %arg8[%c1_96, %c0_97, %c0_98] : memref<2x32x32xbf16, #tpu.memory_space<vmem>>, vector<1x32x32xbf16>
    %213 = vector.shape_cast %212 : vector<1x32x32xbf16> to vector<32x32xbf16>
    %c1_99 = arith.constant 1 : index
    %c0_100 = arith.constant 0 : index
    %c0_101 = arith.constant 0 : index
    %214 = vector.load %arg9[%c1_99, %c0_100, %c0_101] : memref<2x1x32xf32, #tpu.memory_space<vmem>>, vector<1x1x32xf32>
    %215 = vector.shape_cast %214 : vector<1x1x32xf32> to vector<1x32xf32>
    %216 = arith.truncf %195 : vector<16x32xf32> to vector<16x32xbf16>
    %cst_102 = arith.constant dense<0.000000e+00> : vector<16x32xf32>
    %217 = tpu.matmul %216, %213, %cst_102 {dimension_numbers = #tpu.dot_dimension_numbers<[1], [0], [0], [1], [0, 0, 1, 1], [], []>} : vector<16x32xbf16>, vector<32x32xbf16>, vector<16x32xf32> -> vector<16x32xf32>
    %218 = vector.broadcast %215 : vector<1x32xf32> to vector<16x32xf32>
    %219 = arith.addf %217, %218 : vector<16x32xf32>
    %220 = vector.extract_strided_slice %203 {offsets = [0, 0], sizes = [16, 8], strides = [1, 1]} : vector<16x32xf32> to vector<16x8xf32>
    %221 = vector.extract_strided_slice %203 {offsets = [0, 8], sizes = [16, 8], strides = [1, 1]} : vector<16x32xf32> to vector<16x8xf32>
    %222 = vector.extract_strided_slice %203 {offsets = [0, 16], sizes = [16, 8], strides = [1, 1]} : vector<16x32xf32> to vector<16x8xf32>
    %223 = vector.extract_strided_slice %203 {offsets = [0, 24], sizes = [16, 8], strides = [1, 1]} : vector<16x32xf32> to vector<16x8xf32>
    %224 = vector.shape_cast %220 : vector<16x8xf32> to vector<1x16x8xf32>
    %225 = vector.shape_cast %221 : vector<16x8xf32> to vector<1x16x8xf32>
    %226 = vector.shape_cast %222 : vector<16x8xf32> to vector<1x16x8xf32>
    %227 = vector.shape_cast %223 : vector<16x8xf32> to vector<1x16x8xf32>
    %228 = tpu.concatenate %224, %225, %226, %227 in 0 : vector<1x16x8xf32>, vector<1x16x8xf32>, vector<1x16x8xf32>, vector<1x16x8xf32> -> vector<4x16x8xf32>
    %229 = arith.truncf %228 : vector<4x16x8xf32> to vector<4x16x8xbf16>
    %230 = vector.extract_strided_slice %211 {offsets = [0, 0], sizes = [16, 8], strides = [1, 1]} : vector<16x32xf32> to vector<16x8xf32>
    %231 = vector.extract_strided_slice %211 {offsets = [0, 8], sizes = [16, 8], strides = [1, 1]} : vector<16x32xf32> to vector<16x8xf32>
    %232 = vector.extract_strided_slice %211 {offsets = [0, 16], sizes = [16, 8], strides = [1, 1]} : vector<16x32xf32> to vector<16x8xf32>
    %233 = vector.extract_strided_slice %211 {offsets = [0, 24], sizes = [16, 8], strides = [1, 1]} : vector<16x32xf32> to vector<16x8xf32>
    %234 = vector.shape_cast %230 : vector<16x8xf32> to vector<1x16x8xf32>
    %235 = vector.shape_cast %231 : vector<16x8xf32> to vector<1x16x8xf32>
    %236 = vector.shape_cast %232 : vector<16x8xf32> to vector<1x16x8xf32>
    %237 = vector.shape_cast %233 : vector<16x8xf32> to vector<1x16x8xf32>
    %238 = tpu.concatenate %234, %235, %236, %237 in 0 : vector<1x16x8xf32>, vector<1x16x8xf32>, vector<1x16x8xf32>, vector<1x16x8xf32> -> vector<4x16x8xf32>
    %239 = arith.truncf %238 : vector<4x16x8xf32> to vector<4x16x8xbf16>
    %240 = vector.extract_strided_slice %219 {offsets = [0, 0], sizes = [16, 8], strides = [1, 1]} : vector<16x32xf32> to vector<16x8xf32>
    %241 = vector.extract_strided_slice %219 {offsets = [0, 8], sizes = [16, 8], strides = [1, 1]} : vector<16x32xf32> to vector<16x8xf32>
    %242 = vector.extract_strided_slice %219 {offsets = [0, 16], sizes = [16, 8], strides = [1, 1]} : vector<16x32xf32> to vector<16x8xf32>
    %243 = vector.extract_strided_slice %219 {offsets = [0, 24], sizes = [16, 8], strides = [1, 1]} : vector<16x32xf32> to vector<16x8xf32>
    %244 = vector.shape_cast %240 : vector<16x8xf32> to vector<1x16x8xf32>
    %245 = vector.shape_cast %241 : vector<16x8xf32> to vector<1x16x8xf32>
    %246 = vector.shape_cast %242 : vector<16x8xf32> to vector<1x16x8xf32>
    %247 = vector.shape_cast %243 : vector<16x8xf32> to vector<1x16x8xf32>
    %248 = tpu.concatenate %244, %245, %246, %247 in 0 : vector<1x16x8xf32>, vector<1x16x8xf32>, vector<1x16x8xf32>, vector<1x16x8xf32> -> vector<4x16x8xf32>
    %249 = arith.truncf %248 : vector<4x16x8xf32> to vector<4x16x8xbf16>
    "tpu.trace_start"() <{level = 10 : i32, message = "hqd,hkd->hqk"}> : () -> ()
    %cst_103 = arith.constant dense<0.000000e+00> : vector<4x16x16xf32>
    %250 = tpu.matmul %229, %239, %cst_103 {dimension_numbers = #tpu.dot_dimension_numbers<[2], [2], [1], [1], [0, 0, 0, 1, 1, 1], [0], [0]>} : vector<4x16x8xbf16>, vector<4x16x8xbf16>, vector<4x16x16xf32> -> vector<4x16x16xf32>
    "tpu.trace_stop"() : () -> ()
    %251 = vector.shape_cast %25 : vector<16x16xf32> to vector<1x16x16xf32>
    %252 = vector.broadcast %251 : vector<1x16x16xf32> to vector<4x16x16xf32>
    %253 = arith.addf %250, %252 : vector<4x16x16xf32>
    %cst_104 = arith.constant dense<0xFF800000> : vector<4x16xf32>
    %254 = vector.multi_reduction <maximumf>, %253, %cst_104 [2] : vector<4x16x16xf32> to vector<4x16xf32>
    %255 = vector.shape_cast %254 : vector<4x16xf32> to vector<4x16x1xf32>
    %256 = vector.broadcast %255 : vector<4x16x1xf32> to vector<4x16x16xf32>
    %257 = arith.subf %253, %256 : vector<4x16x16xf32>
    %258 = math.exp %257 : vector<4x16x16xf32>
    %cst_105 = arith.constant dense<0.000000e+00> : vector<4x16xf32>
    %259 = vector.multi_reduction <add>, %258, %cst_105 [2] : vector<4x16x16xf32> to vector<4x16xf32>
    %260 = vector.shape_cast %259 : vector<4x16xf32> to vector<4x16x1xf32>
    %261 = tpu.reciprocal %260 {approx = true} : vector<4x16x1xf32> -> vector<4x16x1xf32>
    %262 = vector.broadcast %261 : vector<4x16x1xf32> to vector<4x16x16xf32>
    %263 = arith.mulf %258, %262 : vector<4x16x16xf32>
    %264 = arith.truncf %263 : vector<4x16x16xf32> to vector<4x16x16xbf16>
    "tpu.trace_start"() <{level = 10 : i32, message = "hqk,hkd->hqd"}> : () -> ()
    %cst_106 = arith.constant dense<0.000000e+00> : vector<4x16x8xf32>
    %265 = tpu.matmul %264, %249, %cst_106 {dimension_numbers = #tpu.dot_dimension_numbers<[2], [1], [1], [2], [0, 0, 0, 1, 1, 2], [0], [0]>} : vector<4x16x16xbf16>, vector<4x16x8xbf16>, vector<4x16x8xf32> -> vector<4x16x8xf32>
    "tpu.trace_stop"() : () -> ()
    %266 = vector.extract_strided_slice %265 {offsets = [0, 0, 0], sizes = [1, 16, 8], strides = [1, 1, 1]} : vector<4x16x8xf32> to vector<1x16x8xf32>
    %267 = vector.shape_cast %266 : vector<1x16x8xf32> to vector<16x8xf32>
    %268 = vector.extract_strided_slice %265 {offsets = [1, 0, 0], sizes = [1, 16, 8], strides = [1, 1, 1]} : vector<4x16x8xf32> to vector<1x16x8xf32>
    %269 = vector.shape_cast %268 : vector<1x16x8xf32> to vector<16x8xf32>
    %270 = vector.extract_strided_slice %265 {offsets = [2, 0, 0], sizes = [1, 16, 8], strides = [1, 1, 1]} : vector<4x16x8xf32> to vector<1x16x8xf32>
    %271 = vector.shape_cast %270 : vector<1x16x8xf32> to vector<16x8xf32>
    %272 = vector.extract_strided_slice %265 {offsets = [3, 0, 0], sizes = [1, 16, 8], strides = [1, 1, 1]} : vector<4x16x8xf32> to vector<1x16x8xf32>
    %273 = vector.shape_cast %272 : vector<1x16x8xf32> to vector<16x8xf32>
    %274 = tpu.concatenate %267, %269, %271, %273 in 1 : vector<16x8xf32>, vector<16x8xf32>, vector<16x8xf32>, vector<16x8xf32> -> vector<16x32xf32>
    %c1_107 = arith.constant 1 : index
    %c0_108 = arith.constant 0 : index
    %c0_109 = arith.constant 0 : index
    %275 = vector.load %arg10[%c1_107, %c0_108, %c0_109] : memref<2x32x32xbf16, #tpu.memory_space<vmem>>, vector<1x32x32xbf16>
    %276 = vector.shape_cast %275 : vector<1x32x32xbf16> to vector<32x32xbf16>
    %c1_110 = arith.constant 1 : index
    %c0_111 = arith.constant 0 : index
    %c0_112 = arith.constant 0 : index
    %277 = vector.load %arg11[%c1_110, %c0_111, %c0_112] : memref<2x1x32xf32, #tpu.memory_space<vmem>>, vector<1x1x32xf32>
    %278 = vector.shape_cast %277 : vector<1x1x32xf32> to vector<1x32xf32>
    %279 = arith.truncf %274 : vector<16x32xf32> to vector<16x32xbf16>
    %cst_113 = arith.constant dense<0.000000e+00> : vector<16x32xf32>
    %280 = tpu.matmul %279, %276, %cst_113 {dimension_numbers = #tpu.dot_dimension_numbers<[1], [0], [0], [1], [0, 0, 1, 1], [], []>} : vector<16x32xbf16>, vector<32x32xbf16>, vector<16x32xf32> -> vector<16x32xf32>
    %281 = vector.broadcast %278 : vector<1x32xf32> to vector<16x32xf32>
    %282 = arith.addf %280, %281 : vector<16x32xf32>
    %283 = arith.addf %282, %195 : vector<16x32xf32>
    %c1_114 = arith.constant 1 : index
    %c0_115 = arith.constant 0 : index
    %c0_116 = arith.constant 0 : index
    %284 = vector.load %arg12[%c1_114, %c0_115, %c0_116] : memref<2x1x32xf32, #tpu.memory_space<vmem>>, vector<1x1x32xf32>
    %285 = vector.shape_cast %284 : vector<1x1x32xf32> to vector<1x32xf32>
    %c1_117 = arith.constant 1 : index
    %c0_118 = arith.constant 0 : index
    %c0_119 = arith.constant 0 : index
    %286 = vector.load %arg13[%c1_117, %c0_118, %c0_119] : memref<2x1x32xf32, #tpu.memory_space<vmem>>, vector<1x1x32xf32>
    %287 = vector.shape_cast %286 : vector<1x1x32xf32> to vector<1x32xf32>
    %cst_120 = arith.constant dense<0.000000e+00> : vector<16xf32>
    %288 = vector.multi_reduction <add>, %283, %cst_120 [1] : vector<16x32xf32> to vector<16xf32>
    %289 = vector.shape_cast %288 : vector<16xf32> to vector<16x1xf32>
    %cst_121 = arith.constant 3.200000e+01 : f32
    %290 = vector.broadcast %cst_121 : f32 to vector<16x1xf32>
    %291 = arith.divf %289, %290 : vector<16x1xf32>
    %292 = vector.broadcast %291 : vector<16x1xf32> to vector<16x32xf32>
    %293 = arith.subf %283, %292 : vector<16x32xf32>
    %294 = arith.mulf %293, %293 : vector<16x32xf32>
    %cst_122 = arith.constant dense<0.000000e+00> : vector<16xf32>
    %295 = vector.multi_reduction <add>, %294, %cst_122 [1] : vector<16x32xf32> to vector<16xf32>
    %296 = vector.shape_cast %295 : vector<16xf32> to vector<16x1xf32>
    %cst_123 = arith.constant 3.200000e+01 : f32
    %297 = vector.broadcast %cst_123 : f32 to vector<16x1xf32>
    %298 = arith.divf %296, %297 : vector<16x1xf32>
    %299 = vector.broadcast %291 : vector<16x1xf32> to vector<16x32xf32>
    %300 = arith.subf %283, %299 : vector<16x32xf32>
    %cst_124 = arith.constant 9.99999996E-13 : f32
    %301 = vector.broadcast %cst_124 : f32 to vector<16x1xf32>
    %302 = arith.addf %298, %301 : vector<16x1xf32>
    %303 = math.rsqrt %302 : vector<16x1xf32>
    %304 = vector.broadcast %303 : vector<16x1xf32> to vector<16x32xf32>
    %305 = arith.mulf %300, %304 : vector<16x32xf32>
    %306 = vector.broadcast %285 : vector<1x32xf32> to vector<16x32xf32>
    %307 = arith.mulf %305, %306 : vector<16x32xf32>
    %308 = vector.broadcast %287 : vector<1x32xf32> to vector<16x32xf32>
    %309 = arith.addf %307, %308 : vector<16x32xf32>
    %c1_125 = arith.constant 1 : index
    %c0_126 = arith.constant 0 : index
    %c0_127 = arith.constant 0 : index
    %310 = vector.load %arg14[%c1_125, %c0_126, %c0_127] : memref<2x32x64xbf16, #tpu.memory_space<vmem>>, vector<1x32x64xbf16>
    %311 = vector.shape_cast %310 : vector<1x32x64xbf16> to vector<32x64xbf16>
    %c1_128 = arith.constant 1 : index
    %c0_129 = arith.constant 0 : index
    %c0_130 = arith.constant 0 : index
    %312 = vector.load %arg15[%c1_128, %c0_129, %c0_130] : memref<2x1x64xf32, #tpu.memory_space<vmem>>, vector<1x1x64xf32>
    %313 = vector.shape_cast %312 : vector<1x1x64xf32> to vector<1x64xf32>
    %314 = arith.truncf %309 : vector<16x32xf32> to vector<16x32xbf16>
    %cst_131 = arith.constant dense<0.000000e+00> : vector<16x64xf32>
    %315 = tpu.matmul %314, %311, %cst_131 {dimension_numbers = #tpu.dot_dimension_numbers<[1], [0], [0], [1], [0, 0, 1, 1], [], []>} : vector<16x32xbf16>, vector<32x64xbf16>, vector<16x64xf32> -> vector<16x64xf32>
    %316 = vector.broadcast %313 : vector<1x64xf32> to vector<16x64xf32>
    %317 = arith.addf %315, %316 : vector<16x64xf32>
    %318 = arith.mulf %317, %317 : vector<16x64xf32>
    %319 = arith.mulf %317, %318 : vector<16x64xf32>
    %cst_132 = arith.constant 4.471500e-02 : f32
    %320 = vector.broadcast %cst_132 : f32 to vector<16x64xf32>
    %321 = arith.mulf %320, %319 : vector<16x64xf32>
    %322 = arith.addf %317, %321 : vector<16x64xf32>
    %cst_133 = arith.constant 0.797884583 : f32
    %323 = vector.broadcast %cst_133 : f32 to vector<16x64xf32>
    %324 = arith.mulf %323, %322 : vector<16x64xf32>
    %325 = math.tanh %324 : vector<16x64xf32>
    %cst_134 = arith.constant 1.000000e+00 : f32
    %326 = vector.broadcast %cst_134 : f32 to vector<16x64xf32>
    %327 = arith.addf %326, %325 : vector<16x64xf32>
    %cst_135 = arith.constant 5.000000e-01 : f32
    %328 = vector.broadcast %cst_135 : f32 to vector<16x64xf32>
    %329 = arith.mulf %328, %327 : vector<16x64xf32>
    %330 = arith.mulf %317, %329 : vector<16x64xf32>
    %c1_136 = arith.constant 1 : index
    %c0_137 = arith.constant 0 : index
    %c0_138 = arith.constant 0 : index
    %331 = vector.load %arg16[%c1_136, %c0_137, %c0_138] : memref<2x64x32xbf16, #tpu.memory_space<vmem>>, vector<1x64x32xbf16>
    %332 = vector.shape_cast %331 : vector<1x64x32xbf16> to vector<64x32xbf16>
    %c1_139 = arith.constant 1 : index
    %c0_140 = arith.constant 0 : index
    %c0_141 = arith.constant 0 : index
    %333 = vector.load %arg17[%c1_139, %c0_140, %c0_141] : memref<2x1x32xf32, #tpu.memory_space<vmem>>, vector<1x1x32xf32>
    %334 = vector.shape_cast %333 : vector<1x1x32xf32> to vector<1x32xf32>
    %335 = arith.truncf %330 : vector<16x64xf32> to vector<16x64xbf16>
    %cst_142 = arith.constant dense<0.000000e+00> : vector<16x32xf32>
    %336 = tpu.matmul %335, %332, %cst_142 {dimension_numbers = #tpu.dot_dimension_numbers<[1], [0], [0], [1], [0, 0, 1, 1], [], []>} : vector<16x64xbf16>, vector<64x32xbf16>, vector<16x32xf32> -> vector<16x32xf32>
    %337 = vector.broadcast %334 : vector<1x32xf32> to vector<16x32xf32>
    %338 = arith.addf %336, %337 : vector<16x32xf32>
    %339 = arith.addf %338, %309 : vector<16x32xf32>
    %c1_143 = arith.constant 1 : index
    %c0_144 = arith.constant 0 : index
    %c0_145 = arith.constant 0 : index
    %340 = vector.load %arg18[%c1_143, %c0_144, %c0_145] : memref<2x1x32xf32, #tpu.memory_space<vmem>>, vector<1x1x32xf32>
    %341 = vector.shape_cast %340 : vector<1x1x32xf32> to vector<1x32xf32>
    %c1_146 = arith.constant 1 : index
    %c0_147 = arith.constant 0 : index
    %c0_148 = arith.constant 0 : index
    %342 = vector.load %arg19[%c1_146, %c0_147, %c0_148] : memref<2x1x32xf32, #tpu.memory_space<vmem>>, vector<1x1x32xf32>
    %343 = vector.shape_cast %342 : vector<1x1x32xf32> to vector<1x32xf32>
    %cst_149 = arith.constant dense<0.000000e+00> : vector<16xf32>
    %344 = vector.multi_reduction <add>, %339, %cst_149 [1] : vector<16x32xf32> to vector<16xf32>
    %345 = vector.shape_cast %344 : vector<16xf32> to vector<16x1xf32>
    %cst_150 = arith.constant 3.200000e+01 : f32
    %346 = vector.broadcast %cst_150 : f32 to vector<16x1xf32>
    %347 = arith.divf %345, %346 : vector<16x1xf32>
    %348 = vector.broadcast %347 : vector<16x1xf32> to vector<16x32xf32>
    %349 = arith.subf %339, %348 : vector<16x32xf32>
    %350 = arith.mulf %349, %349 : vector<16x32xf32>
    %cst_151 = arith.constant dense<0.000000e+00> : vector<16xf32>
    %351 = vector.multi_reduction <add>, %350, %cst_151 [1] : vector<16x32xf32> to vector<16xf32>
    %352 = vector.shape_cast %351 : vector<16xf32> to vector<16x1xf32>
    %cst_152 = arith.constant 3.200000e+01 : f32
    %353 = vector.broadcast %cst_152 : f32 to vector<16x1xf32>
    %354 = arith.divf %352, %353 : vector<16x1xf32>
    %355 = vector.broadcast %347 : vector<16x1xf32> to vector<16x32xf32>
    %356 = arith.subf %339, %355 : vector<16x32xf32>
    %cst_153 = arith.constant 9.99999996E-13 : f32
    %357 = vector.broadcast %cst_153 : f32 to vector<16x1xf32>
    %358 = arith.addf %354, %357 : vector<16x1xf32>
    %359 = math.rsqrt %358 : vector<16x1xf32>
    %360 = vector.broadcast %359 : vector<16x1xf32> to vector<16x32xf32>
    %361 = arith.mulf %356, %360 : vector<16x32xf32>
    %362 = vector.broadcast %341 : vector<1x32xf32> to vector<16x32xf32>
    %363 = arith.mulf %361, %362 : vector<16x32xf32>
    %364 = vector.broadcast %343 : vector<1x32xf32> to vector<16x32xf32>
    %365 = arith.addf %363, %364 : vector<16x32xf32>
    %c0_154 = arith.constant 0 : index
    %c0_155 = arith.constant 0 : index
    %366 = vector.load %arg20[%c0_154, %c0_155] : memref<32x32xbf16, #tpu.memory_space<vmem>>, vector<32x32xbf16>
    %c0_156 = arith.constant 0 : index
    %c0_157 = arith.constant 0 : index
    %367 = vector.load %arg21[%c0_156, %c0_157] : memref<1x32xf32, #tpu.memory_space<vmem>>, vector<1x32xf32>
    %368 = arith.truncf %365 : vector<16x32xf32> to vector<16x32xbf16>
    %cst_158 = arith.constant dense<0.000000e+00> : vector<16x32xf32>
    %369 = tpu.matmul %368, %366, %cst_158 {dimension_numbers = #tpu.dot_dimension_numbers<[1], [0], [0], [1], [0, 0, 1, 1], [], []>} : vector<16x32xbf16>, vector<32x32xbf16>, vector<16x32xf32> -> vector<16x32xf32>
    %370 = vector.broadcast %367 : vector<1x32xf32> to vector<16x32xf32>
    %371 = arith.addf %369, %370 : vector<16x32xf32>
    %372 = math.tanh %371 : vector<16x32xf32>
    %c0_159 = arith.constant 0 : index
    %c0_160 = arith.constant 0 : index
    %373 = vector.load %arg22[%c0_159, %c0_160] : memref<32x128xbf16, #tpu.memory_space<vmem>>, vector<32x128xbf16>
    %c0_161 = arith.constant 0 : index
    %c0_162 = arith.constant 0 : index
    %374 = vector.load %arg23[%c0_161, %c0_162] : memref<1x128xf32, #tpu.memory_space<vmem>>, vector<1x128xf32>
    %375 = arith.truncf %372 : vector<16x32xf32> to vector<16x32xbf16>
    %cst_163 = arith.constant dense<0.000000e+00> : vector<16x128xf32>
    %376 = tpu.matmul %375, %373, %cst_163 {dimension_numbers = #tpu.dot_dimension_numbers<[1], [0], [0], [1], [0, 0, 1, 1], [], []>} : vector<16x32xbf16>, vector<32x128xbf16>, vector<16x128xf32> -> vector<16x128xf32>
    %377 = vector.broadcast %374 : vector<1x128xf32> to vector<16x128xf32>
    %378 = arith.addf %376, %377 : vector<16x128xf32>
    %c0_164 = arith.constant 0 : index
    %c0_165 = arith.constant 0 : index
    %379 = vector.load %arg24[%c0_164, %c0_165] : memref<16x128xf32, #tpu.memory_space<vmem>>, vector<16x128xf32>
    tpu.vector_store %arg24[%c0_164, %c0_165], %378 {strides = array<i32>} : memref<16x128xf32, #tpu.memory_space<vmem>>, vector<16x128xf32>,
    return
  }
}

</mosaic_0001>

<bundles_post_ra>
// kernel: squeeze.3
= control target key start
LH: loop header
LB: loop body
LE: loop exit
PB: predicated region body
PF: predicated region fallthrough
CT: control target
= control target key end

     0   :  { %vm8_vm0 = vcmask 39936   ;;  %s40_s8 = smov 118   ;;  %s60_s0 = inlined_call_operand.vmem [shape: f32[2,1,15], index: 0, kind: input, shape index: {}]   ;;  %s61_s1 = inlined_call_operand.vmem [shape: f32[2,3,5], index: 1, kind: output, shape index: {}]  }
   0x1   :  { %v5_v0 = vld [vmem:[%s60_s0] sm:$0x3]  ;;  %s39_s0 = smov 123  }
   0x2   :  { %6 = vst [vmem:[#allocation1] sm:$0x3] %v5_v0 }
   0x9   :  { %v10_v1 = vld [vmem:[#allocation1] sm:$0x3]  }
   0xa   :  { %v7_v2 = vld [vmem:[#allocation1] sm:$0x3]   ;;  %11 = vrot.lane.b32.xlu0 %v10_v1, %s39_s0 }
   0xb   :  { %9 = vst.msk [vmem:[#allocation0] ss:$8 sm:$0x3] %vm8_vm0, %v7_v2   ;;  %v16_v3 = vld [vmem:[#allocation1] sm:$0x3]  }
   0xe   :  { %17 = vrot.lane.b32.xlu0 %v16_v3, %s40_s8 }
  0x7c   :  { %v12_v4 = vpop.permute.xlu0 %11  }
  0x7d   :  { %15 = vst.msk [vmem:[#allocation0 + $0x1] ss:$8 sm:$0x3] %vm8_vm0, %v12_v4  }
  0x80   :  { %v18_v5 = vpop.permute.xlu0 %17  }
  0x81   :  { %21 = vst.msk [vmem:[#allocation0 + $0x2] ss:$8 sm:$0x3] %vm8_vm0, %v18_v5  }
  0x88   :  { %v26_v6 = vld [vmem:[#allocation0] sm:$0xf]  ;;  %v31_v7 = vld [vmem:[#allocation0 + $0x8] sm:$0xf] }
  0x89   :  { %29 = vst [vmem:[%s61_s1] sm:$0xf] %v26_v6  ;;  %36 = vst [vmem:[%s61_s1 + $0x4] sm:$0xf] %v31_v7 }

// kernel: emotion_bert_forward.1
= control target key start
LH: loop header
LB: loop body
LE: loop exit
PB: predicated region body
PF: predicated region fallthrough
CT: control target
= control target key end

     0   :  { %vm82_vm0 = vcmask 261120   ;;  %v3136_v14 = vmov 0.0   ;;  %vm3137_vm1 = vmmov 0   ;;  %vm396_vm2 = vcmask 64512   ;;  %s3783_s29 = smov 24   ;;  %s3751_s0 = inlined_call_operand.vmem [shape: f32[16,32], index: 0, kind: input, shape index: {}]   ;;  %s3752_s4 = inlined_call_operand.vmem [shape: bf16[2,32,32], index: 4, kind: input, shape index: {}]   ;;  %s3753_s6 = inlined_call_operand.vmem [shape: bf16[2,32,32], index: 6, kind: input, shape index: {}]   ;;  %s3754_s8 = inlined_call_operand.vmem [shape: bf16[2,32,32], index: 8, kind: input, shape index: {}]   ;;  %s3755_s2 = inlined_call_operand.vmem [shape: f32[1,32], index: 2, kind: input, shape index: {}]   ;;  %s3756_s3 = inlined_call_operand.vmem [shape: f32[1,32], index: 3, kind: input, shape index: {}]   ;;  %s3757_s7 = inlined_call_operand.vmem [shape: f32[2,1,32], index: 7, kind: input, shape index: {}]   ;;  %s3758_s5 = inlined_call_operand.vmem [shape: f32[2,1,32], index: 5, kind: input, shape index: {}]   ;;  %s3759_s9 = inlined_call_operand.vmem [shape: f32[2,1,32], index: 9, kind: input, shape index: {}]   ;;  %s3760_s1 = inlined_call_operand.vmem [shape: f32[16,16], index: 1, kind: input, shape index: {}]   ;;  %s3761_s10 = inlined_call_operand.vmem [shape: bf16[2,32,32], index: 10, kind: input, shape index: {}]   ;;  %s3762_s11 = inlined_call_operand.vmem [shape: f32[2,1,32], index: 11, kind: input, shape index: {}]   ;;  %s3763_s14 = inlined_call_operand.vmem [shape: bf16[2,32,64], index: 14, kind: input, shape index: {}]   ;;  %s3764_s12 = inlined_call_operand.vmem [shape: f32[2,1,32], index: 12, kind: input, shape index: {}]   ;;  %s3765_s13 = inlined_call_operand.vmem [shape: f32[2,1,32], index: 13, kind: input, shape index: {}]   ;;  %s3766_s16 = inlined_call_operand.vmem [shape: bf16[2,64,32], index: 16, kind: input, shape index: {}]   ;;  %s3767_s15 = inlined_call_operand.vmem [shape: f32[2,1,64], index: 15, kind: input, shape index: {}]   ;;  %s3768_s17 = inlined_call_operand.vmem [shape: f32[2,1,32], index: 17, kind: input, shape index: {}]   ;;  %s3769_s18 = inlined_call_operand.vmem [shape: f32[2,1,32], index: 18, kind: input, shape index: {}]   ;;  %s3770_s19 = inlined_call_operand.vmem [shape: f32[2,1,32], index: 19, kind: input, shape index: {}]   ;;  %s3771_s20 = inlined_call_operand.vmem [shape: bf16[32,32], index: 20, kind: input, shape index: {}]   ;;  %s3772_s22 = inlined_call_operand.vmem [shape: bf16[32,128], index: 22, kind: input, shape index: {}]   ;;  %s3773_s21 = inlined_call_operand.vmem [shape: f32[1,32], index: 21, kind: input, shape index: {}]   ;;  %s3774_s23 = inlined_call_operand.vmem [shape: f32[1,128], index: 23, kind: input, shape index: {}]   ;;  %s3775_s24 = inlined_call_operand.vmem [shape: f32[16,128], index: 24, kind: output, shape index: {}]  }
   0x1   :  { %3790 = sst [smem:[#allocation2_spill]] %s3751_s0  ;;  %2662 = vmatprep.subr.bf16.mxu0 %v3136_v14  ;;  %2670 = vmatprep.subr.bf16.mxu1 %v3136_v14  ;;  %vm585_vm3 = vcmask 130048   ;;  %vm882_vm4 = vcmask 195584   ;;  %vm1125_vm5 = vcmask 523264  }
   0x2   :  { %3791 = sst [smem:[#allocation3_spill]] %s3752_s4  ;;  %2666 = vmatprep.mubr.msk.bf16.mxu0 %vm3137_vm1, %v3136_v14  ;;  %2674 = vmatprep.mubr.msk.bf16.mxu1 %vm3137_vm1, %v3136_v14  ;;  %s3784_s4 = smov 16  }
   0x3   :  { %3792 = sst [smem:[#allocation4_spill]] %s3753_s6 }
   0x4   :  { %3793 = sst [smem:[#allocation5_spill]] %s3754_s8 }
   0x5   :  { %3794 = sst [smem:[#allocation6_spill]] %s3755_s2  ;;  %s3785_s2 = smov 8  }
   0x6   :  { %3795 = sst [smem:[#allocation7_spill]] %s3756_s3 }
   0x7   :  { %3796 = sst [smem:[#allocation8_spill]] %s3757_s7  ;;  %s3788_s7 = smov 112  }
   0x8   :  { %3797 = sst [smem:[#allocation9_spill]] %s3758_s5  ;;  %s3812_s5 = smov 24  }
   0x9   :  { %3798 = sst [smem:[#allocation10_spill]] %s3759_s9  ;;  %s3786_s9 = smov 104  }
   0xa   :  { %s3799_s27 = sld [smem:[#allocation2_spill]] }
   0xb   :  { %s3800_s0 = sld [smem:[#allocation3_spill]] }
   0xc   :  { %s3801_s8 = sld [smem:[#allocation4_spill]] }
   0xd   :  { %s3803_s6 = sld [smem:[#allocation7_spill]] }
   0xe   :  { %s3804_s30 = sld [smem:[#allocation5_spill]] }
   0xf   :  { %s3805_s3 = sld [smem:[#allocation8_spill]] }
  0x10   :  { %v78_v0 = vld [vmem:[%s3799_s27] sm:$0xff]  ;;  %v79_v1 = vld [vmem:[%s3799_s27 + $0x8] sm:$0xff]  ;;  %s3802_s27 = sld [smem:[#allocation6_spill]] }
  0x11   :  { %v83_v2 = vsel %vm82_vm0, %v78_v0, 0.0  ;;  %v86_v3 = vsel %vm82_vm0, %v79_v1, 0.0  ;;  %v3006_v15 = vld [vmem:[%s3800_s0 + $0x8] sm:$0xff]   ;;  %v3008_v17 = vld [vmem:[%s3800_s0] sm:$0xff]   ;;  %s3806_s28 = sld [smem:[#allocation9_spill]] }
  0x12   :  { %84 = vadd.xlane.f32.xlu0 %v83_v2  ;;  %v3007_v16 = vld [vmem:[%s3801_s8 + $0x8] sm:$0xff]   ;;  %2663 = vmatpush3.bf16.msra.mxu0 %v3006_v15  ;;  %v3009_v18 = vld [vmem:[%s3801_s8] sm:$0xff]   ;;  %s3807_s25 = sld [smem:[#allocation10_spill]] }
  0x13   :  { %2671 = vmatpush3.bf16.msra.mxu1 %v3007_v16  ;;  %2664 = vmatprep.subr.bf16.mxu0 %v3136_v14  ;;  %v2461_v31 = vld [vmem:[%s3803_s6] ss:$0 sm:$0xff]  ;;  %s3139_s6 = smov 120  }
  0x14   :  { %2672 = vmatprep.subr.bf16.mxu1 %v3136_v14  ;;  %v3010_v35 = vld [vmem:[%s3804_s30 + $0x8] sm:$0xff]   ;;  %v3011_v37 = vld [vmem:[%s3804_s30] sm:$0xff]  }
  0x15   :  { %v2466_v40 = vld [vmem:[%s3805_s3] ss:$0 sm:$0xff] }
  0x16   :  { %87 = vadd.xlane.f32.xlu0 %v86_v3  ;;  %2665 = vmatpush3.bf16.msra.mxu0 %v3008_v17  ;;  %v2460_v27 = vld [vmem:[%s3802_s27] ss:$0 sm:$0xff]  ;;  %s3811_s27 = smov 16  }
  0x17   :  { %2673 = vmatpush3.bf16.msra.mxu1 %v3009_v18  ;;  %2678 = vmatprep.subr.bf16.mxu0 %v3136_v14  ;;  %v2462_v47 = vld [vmem:[%s3806_s28] ss:$0 sm:$0xff] }
  0x18   :  { %2686 = vmatprep.subr.bf16.mxu1 %v3136_v14  ;;  %v2470_v56 = vld [vmem:[%s3807_s25] ss:$0 sm:$0xff] }
  0x9b   :  { %v85_v4 = vpop.xlane.xlu0 %84 }
  0x9c   :  { %v90_v5 = vmul.f32 0.03125, %v85_v4 }
  0x9e   :  { %v92_v6 = vsub.f32 %v78_v0, %v90_v5 }
  0x9f   :  { %v88_v7 = vpop.xlane.xlu0 %87 }
  0xa0   :  { %v91_v8 = vmul.f32 0.03125, %v88_v7  ;;  %v94_v9 = vmul.f32 %v92_v6, %v92_v6 }
  0xa2   :  { %v93_v10 = vsub.f32 %v79_v1, %v91_v8  ;;  %v96_v11 = vsel %vm82_vm0, %v94_v9, 0.0 }
  0xa3   :  { %97 = vadd.xlane.f32.xlu1 %v96_v11 }
  0xa4   :  { %v95_v12 = vmul.f32 %v93_v10, %v93_v10 }
  0xa6   :  { %v99_v13 = vsel %vm82_vm0, %v95_v12, 0.0 }
  0xa7   :  { %100 = vadd.xlane.f32.xlu1 %v99_v13 }
 0x12c   :  { %v98_v19 = vpop.xlane.xlu1 %97 }
 0x12d   :  { %v102_v20 = vmul.f32 0.03125, %v98_v19 }
 0x12f   :  { %v104_v21 = vadd.f32 1e-12, %v102_v20 }
 0x130   :  { %v101_v22 = vpop.xlane.xlu1 %100 }
 0x131   :  { %3038 = vrsqrt.f32 %v104_v21  ;;  %v103_v23 = vmul.f32 0.03125, %v101_v22 }
 0x133   :  { %v105_v24 = vadd.f32 1e-12, %v103_v23 }
 0x135   :  { %3040 = vrsqrt.f32 %v105_v24 }
 0x13e   :  { %v3039_v25 = vpop.eup %3038 }
 0x13f   :  { %v108_v26 = vmul.f32 %v3039_v25, %v92_v6 }
 0x141   :  { %v116_v30 = vmul.f32 %v2460_v27, %v108_v26 }
 0x142   :  { %v3041_v28 = vpop.eup %3040 }
 0x143   :  { %v109_v29 = vmul.f32 %v3041_v28, %v93_v10  ;;  %v3307_v33 = vadd.f32 %v2461_v31, %v116_v30  ;;  %v3371_v30 = vld [vmem:[%s3760_s1] sm:$0xff] }
 0x145   :  { %v117_v32 = vmul.f32 %v2460_v27, %v109_v29 }
 0x147   :  { %v3309_v34 = vadd.f32 %v2461_v31, %v117_v32 }
 0x149   :  { %v133_v36 = vpack.c.bf16 %v3309_v34, %v3307_v33 }
 0x14b   :  { %2667 = vmatmul.mubr.msk.bf16.vlgmr.msra.gmra.mxu0 %vm82_vm0, %v133_v36  ;;  %2675 = vmatmul.mubr.msk.bf16.vlgmr.msra.gmra.mxu1 %vm82_vm0, %v133_v36 }
 0x14c   :  { %2679 = vmatpush3.bf16.msra.mxu0 %v3010_v35  ;;  %2682 = vmatprep.mubr.msk.bf16.mxu0 %vm3137_vm1, %v3136_v14 }
 0x14d   :  { %2680 = vmatprep.subr.bf16.mxu0 %v3136_v14  ;;  %2688 = vmatprep.mubr.msk.bf16.mxu1 %vm3137_vm1, %v3136_v14 }
 0x150   :  { %2681 = vmatpush3.bf16.msra.mxu0 %v3011_v37 }
 0x151   :  { %2692 = vmatprep.subr.bf16.mxu0 %v3136_v14 }
 0x153   :  { %2683 = vmatmul.mubr.msk.bf16.vlgmr.msra.gmra.mxu0 %vm82_vm0, %v133_v36  ;;  %v3377_v36 = vld [vmem:[%s3760_s1 + $0x8] sm:$0xff] }
 0x154   :  { %2694 = vmatprep.mubr.msk.bf16.mxu0 %vm3137_vm1, %v3136_v14 }
 0x20b   :  { %v189_v38 = vpop.f32.mrf.mxu0  ;;  %v253_v39 = vpop.f32.mrf.mxu1 }
 0x20c   :  { %v254_v45 = vadd.f32 %v2466_v40, %v253_v39  ;;  %v190_v54 = vadd.f32 %v2462_v47, %v189_v38 }
 0x20d   :  { %v2668_v41 = vpop.f32.mrf.mxu0  ;;  %v2676_v42 = vpop.f32.mrf.mxu1 }
 0x20f   :  { %v192_v43 = vpop.f32.mrf.mxu0  ;;  %v256_v44 = vpop.f32.mrf.mxu1 }
 0x210   :  { %v257_v46 = vadd.f32 %v2466_v40, %v256_v44  ;;  %v193_v50 = vadd.f32 %v2462_v47, %v192_v43 }
 0x211   :  { %v2669_v48 = vpop.f32.mrf.mxu0  ;;  %v2677_v49 = vpop.f32.mrf.mxu1 }
 0x212   :  { %v2891_v51 = vpack.i.bf16 %v257_v46, %v254_v45  ;;  %v368_v52 = vpack.c.bf16 %v257_v46, %v254_v45  ;;  %v2906_v58 = vpack.i.bf16 %v193_v50, %v190_v54  ;;  %v344_v62 = vpack.c.bf16 %v193_v50, %v190_v54 }
 0x213   :  { %v317_v53 = vpop.f32.mrf.mxu0 }
 0x214   :  { %2892 = vrot.lane.b32.xlu1 %v2891_v51, %s3788_s7  ;;  %2887 = vrot.lane.b32.xlu0 %v2891_v51, %s3139_s6  ;;  %v401_v55 = vsel %vm396_vm2, %v368_v52, 0  ;;  %v318_v60 = vadd.f32 %v2470_v56, %v317_v53 }
 0x215   :  { %v2684_v57 = vpop.f32.mrf.mxu0  ;;  %2687 = vmatpush3.bf16.xpose.msra.mxu1 %v401_v55 }
 0x216   :  { %2698 = vmatprep.subr.bf16.mxu1 %v3136_v14 }
 0x217   :  { %v320_v59 = vpop.f32.mrf.mxu0 }
 0x218   :  { %v321_v61 = vadd.f32 %v2470_v56, %v320_v59  ;;  %2907 = vrot.lane.b32.xlu0 %v2906_v58, %s3788_s7  ;;  %2897 = vrot.lane.b32.xlu1 %v2906_v58, %s3139_s6 }
 0x219   :  { %v2685_v63 = vpop.f32.mrf.mxu0 }
 0x21a   :  { %v392_v0 = vpack.c.bf16 %v321_v61, %v318_v60  ;;  %v3345_v1 = vpack.i.bf16 %v321_v61, %v318_v60 }
 0x21c   :  { %2902 = vrot.lane.b32.xlu1 %v2891_v51, %s3786_s9  ;;  %2689 = vmatmul.mubr.msk.bf16.vlgmr.msra.gmra.mxu1 %vm396_vm2, %v344_v62 }
 0x21d   :  { %2700 = vmatprep.mubr.msk.bf16.mxu1 %vm3137_vm1, %v3136_v14 }
 0x220   :  { %2912 = vrot.lane.b32.xlu1 %v2906_v58, %s3786_s9 }
 0x286   :  { %v2893_v2 = vpop.permute.xlu1 %2892  ;;  %v2888_v3 = vpop.permute.xlu0 %2887 }
 0x287   :  { %v2895_v4 = vunpack.i.h.bf16 %v2893_v2  ;;  %v2894_v5 = vunpack.i.l.bf16 %v2893_v2  ;;  %v2890_v6 = vunpack.i.h.bf16 %v2888_v3  ;;  %v2889_v7 = vunpack.i.l.bf16 %v2888_v3 }
 0x289   :  { %v370_v8 = vpack.c.bf16 %v2895_v4, %v2894_v5  ;;  %v369_v9 = vpack.c.bf16 %v2890_v6, %v2889_v7 }
 0x28a   :  { %v2898_v10 = vpop.permute.xlu1 %2897  ;;  %v2908_v11 = vpop.permute.xlu0 %2907 }
 0x28b   :  { %v448_v12 = vsel %vm396_vm2, %v369_v9, 0  ;;  %v495_v13 = vsel %vm396_vm2, %v370_v8, 0  ;;  %v2910_v15 = vunpack.i.h.bf16 %v2908_v11  ;;  %v2909_v16 = vunpack.i.l.bf16 %v2908_v11 }
 0x28c   :  { %2693 = vmatpush3.bf16.xpose.msra.mxu0 %v448_v12  ;;  %2699 = vmatpush3.bf16.xpose.msra.mxu1 %v495_v13  ;;  %v2900_v17 = vunpack.i.h.bf16 %v2898_v10  ;;  %v2899_v18 = vunpack.i.l.bf16 %v2898_v10 }
 0x28d   :  { %2704 = vmatprep.subr.bf16.mxu0 %v3136_v14  ;;  %2710 = vmatprep.subr.bf16.mxu1 %v3136_v14  ;;  %v346_v23 = vpack.c.bf16 %v2910_v15, %v2909_v16 }
 0x28e   :  { %v2903_v19 = vpop.permute.xlu1 %2902  ;;  %v345_v24 = vpack.c.bf16 %v2900_v17, %v2899_v18 }
 0x28f   :  { %v2905_v20 = vunpack.i.h.bf16 %v2903_v19  ;;  %v2904_v21 = vunpack.i.l.bf16 %v2903_v19 }
 0x291   :  { %v371_v22 = vpack.c.bf16 %v2905_v20, %v2904_v21 }
 0x292   :  { %v2913_v25 = vpop.permute.xlu1 %2912 }
 0x293   :  { %v542_v26 = vsel %vm396_vm2, %v371_v22, 0  ;;  %2695 = vmatmul.mubr.msk.bf16.vlgmr.msra.gmra.mxu0 %vm396_vm2, %v345_v24  ;;  %2701 = vmatmul.mubr.msk.bf16.vlgmr.msra.gmra.mxu1 %vm396_vm2, %v346_v23  ;;  %v2915_v27 = vunpack.i.h.bf16 %v2913_v25  ;;  %v2914_v28 = vunpack.i.l.bf16 %v2913_v25 }
 0x294   :  { %2705 = vmatpush3.bf16.xpose.msra.mxu0 %v542_v26  ;;  %2711 = vmatpush3.bf16.msra.mxu1 %v392_v0 }
 0x295   :  { %2706 = vmatprep.mubr.msk.bf16.mxu0 %vm3137_vm1, %v3136_v14  ;;  %2712 = vmatprep.mubr.msk.bf16.mxu1 %vm3137_vm1, %v3136_v14  ;;  %v347_v29 = vpack.c.bf16 %v2915_v27, %v2914_v28 }
 0x296   :  { %2722 = vmatprep.subr.bf16.mxu1 %v3136_v14  ;;  %2716 = vmatprep.subr.bf16.mxu0 %v3136_v14 }
 0x29b   :  { %2707 = vmatmul.mubr.msk.bf16.vlgmr.msra.gmra.mxu0 %vm396_vm2, %v347_v29 }
 0x29c   :  { %2718 = vmatprep.mubr.msk.bf16.mxu0 %vm3137_vm1, %v3136_v14 }
 0x2dc   :  { %v437_v31 = vpop.f32.mrf.mxu1 }
 0x2dd   :  { %v438_v32 = vadd.f32 %v437_v31, %v3371_v30 }
 0x2de   :  { %v2690_v35 = vpop.f32.mrf.mxu1 }
 0x2df   :  { %v586_v37 = vsel %vm585_vm3, %v438_v32, -inf }
 0x2e0   :  { %587 = vmax.xlane.f32.xlu0 %v586_v37  ;;  %v440_v38 = vpop.f32.mrf.mxu1 }
 0x2e1   :  { %v441_v39 = vadd.f32 %v440_v38, %v3377_v36 }
 0x2e2   :  { %v2691_v40 = vpop.f32.mrf.mxu1 }
 0x2e3   :  { %v589_v41 = vsel %vm585_vm3, %v441_v39, -inf }
 0x2e4   :  { %590 = vmax.xlane.f32.xlu1 %v589_v41 }
 0x353   :  { %v484_v42 = vpop.f32.mrf.mxu0  ;;  %v531_v43 = vpop.f32.mrf.mxu1 }
 0x354   :  { %v485_v44 = vadd.f32 %v484_v42, %v3371_v30  ;;  %v532_v54 = vadd.f32 %v531_v43, %v3371_v30 }
 0x355   :  { %v2696_v45 = vpop.f32.mrf.mxu0  ;;  %v2702_v46 = vpop.f32.mrf.mxu1 }
 0x356   :  { %v592_v47 = vsel %vm585_vm3, %v485_v44, -inf  ;;  %v598_v60 = vsel %vm585_vm3, %v532_v54, -inf }
 0x357   :  { %v534_v48 = vpop.f32.mrf.mxu1  ;;  %593 = vmax.xlane.f32.xlu0 %v592_v47  ;;  %v487_v49 = vpop.f32.mrf.mxu0 }
 0x358   :  { %v535_v50 = vadd.f32 %v534_v48, %v3377_v36  ;;  %v488_v51 = vadd.f32 %v487_v49, %v3377_v36 }
 0x359   :  { %v2697_v52 = vpop.f32.mrf.mxu0  ;;  %v2703_v53 = vpop.f32.mrf.mxu1 }
 0x35a   :  { %v601_v55 = vsel %vm585_vm3, %v535_v50, -inf  ;;  %v595_v56 = vsel %vm585_vm3, %v488_v51, -inf }
 0x35b   :  { %602 = vmax.xlane.f32.xlu1 %v601_v55  ;;  %596 = vmax.xlane.f32.xlu0 %v595_v56  ;;  %v578_v57 = vpop.f32.mrf.mxu0 }
 0x35c   :  { %v579_v59 = vadd.f32 %v578_v57, %v3371_v30 }
 0x35d   :  { %v2708_v58 = vpop.f32.mrf.mxu0 }
 0x35e   :  { %v604_v0 = vsel %vm585_vm3, %v579_v59, -inf }
 0x35f   :  { %599 = vmax.xlane.f32.xlu0 %v598_v60  ;;  %v581_v61 = vpop.f32.mrf.mxu0 }
 0x360   :  { %v3392_v62 = vadd.f32 %v581_v61, %v3377_v36 }
 0x361   :  { %v2709_v63 = vpop.f32.mrf.mxu0 }
 0x362   :  { %v607_v2 = vsel %vm585_vm3, %v3392_v62, -inf }
 0x363   :  { %605 = vmax.xlane.f32.xlu0 %v604_v0  ;;  %608 = vmax.xlane.f32.xlu1 %v607_v2 }
 0x369   :  { %v588_v3 = vpop.xlane.xlu0 %587 }
 0x36a   :  { %v610_v4 = vsub.f32 %v438_v32, %v588_v3 }
 0x36c   :  { %v618_v5 = vmul.f32 1.442695, %v610_v4 }
 0x36d   :  { %v591_v6 = vpop.xlane.xlu1 %590 }
 0x36e   :  { %3042 = vpow2.f32 %v618_v5  ;;  %v611_v7 = vsub.f32 %v441_v39, %v591_v6 }
 0x370   :  { %v620_v8 = vmul.f32 1.442695, %v611_v7 }
 0x372   :  { %3044 = vpow2.f32 %v620_v8 }
 0x37b   :  { %v3043_v9 = vpop.eup %3042 }
 0x37c   :  { %v634_v10 = vsel %vm585_vm3, %v3043_v9, 0.0 }
 0x37d   :  { %635 = vadd.xlane.f32.xlu0 %v634_v10 }
 0x37f   :  { %v3045_v11 = vpop.eup %3044 }
 0x380   :  { %v637_v12 = vsel %vm585_vm3, %v3045_v11, 0.0 }
 0x381   :  { %638 = vadd.xlane.f32.xlu1 %v637_v12 }
 0x3e0   :  { %v594_v13 = vpop.xlane.xlu0 %593 }
 0x3e1   :  { %v612_v15 = vsub.f32 %v485_v44, %v594_v13 }
 0x3e3   :  { %v622_v16 = vmul.f32 1.442695, %v612_v15 }
 0x3e4   :  { %v603_v17 = vpop.xlane.xlu1 %602  ;;  %v597_v18 = vpop.xlane.xlu0 %596 }
 0x3e5   :  { %3046 = vpow2.f32 %v622_v16  ;;  %v615_v19 = vsub.f32 %v535_v50, %v603_v17  ;;  %v613_v20 = vsub.f32 %v488_v51, %v597_v18 }
 0x3e7   :  { %v624_v21 = vmul.f32 1.442695, %v613_v20  ;;  %v628_v22 = vmul.f32 1.442695, %v615_v19 }
 0x3e8   :  { %v600_v23 = vpop.xlane.xlu0 %599 }
 0x3e9   :  { %v614_v24 = vsub.f32 %v532_v54, %v600_v23  ;;  %3048 = vpow2.f32 %v624_v21 }
 0x3ea   :  { %3050 = vpow2.f32 %v628_v22 }
 0x3eb   :  { %v626_v25 = vmul.f32 1.442695, %v614_v24 }
 0x3ec   :  { %v606_v26 = vpop.xlane.xlu0 %605  ;;  %v609_v43 = vpop.xlane.xlu1 %608 }
 0x3ed   :  { %3052 = vpow2.f32 %v626_v25  ;;  %v616_v27 = vsub.f32 %v579_v59, %v606_v26  ;;  %v617_v50 = vsub.f32 %v3392_v62, %v609_v43 }
 0x3ef   :  { %v630_v28 = vmul.f32 1.442695, %v616_v27  ;;  %v632_v52 = vmul.f32 1.442695, %v617_v50 }
 0x3f1   :  { %3054 = vpow2.f32 %v630_v28 }
 0x3f2   :  { %v3047_v29 = vpop.eup %3046 }
 0x3f3   :  { %v640_v31 = vsel %vm585_vm3, %v3047_v29, 0.0 }
 0x3f4   :  { %641 = vadd.xlane.f32.xlu0 %v640_v31  ;;  %v3012_v31 = vld [vmem:[%s3761_s10 + $0x8] sm:$0xff]  }
 0x3f6   :  { %v3049_v32 = vpop.eup %3048 }
 0x3f7   :  { %v643_v35 = vsel %vm585_vm3, %v3049_v32, 0.0  ;;  %v3051_v37 = vpop.eup %3050 }
 0x3f8   :  { %644 = vadd.xlane.f32.xlu1 %v643_v35  ;;  %v649_v40 = vsel %vm585_vm3, %v3051_v37, 0.0 }
 0x3fa   :  { %v3053_v38 = vpop.eup %3052 }
 0x3fb   :  { %v646_v39 = vsel %vm585_vm3, %v3053_v38, 0.0 }
 0x3fc   :  { %647 = vadd.xlane.f32.xlu0 %v646_v39  ;;  %650 = vadd.xlane.f32.xlu1 %v649_v40 }
 0x3fe   :  { %v3403_v41 = vpop.eup %3054 }
 0x3ff   :  { %v652_v42 = vsel %vm585_vm3, %v3403_v41, 0.0 }
 0x400   :  { %653 = vadd.xlane.f32.xlu0 %v652_v42 }
 0x406   :  { %v636_v44 = vpop.xlane.xlu0 %635 }
 0x407   :  { %3056 = vrcp.f32 %v636_v44  ;;  %v3013_v44 = vld [vmem:[%s3761_s10] sm:$0xff]  }
 0x40a   :  { %v639_v45 = vpop.xlane.xlu1 %638 }
 0x40b   :  { %3058 = vrcp.f32 %v639_v45 }
 0x40c   :  { %3060 = vpow2.f32 %v632_v52 }
 0x40d   :  { %2922 = vrot.lane.b32.xlu1 %v3345_v1, %s3788_s7  ;;  %s3809_s7 = smov 104  }
 0x414   :  { %v3057_v46 = vpop.eup %3056 }
 0x415   :  { %v666_v48 = vmul.f32 %v3057_v46, %v3043_v9 }
 0x416   :  { %2917 = vrot.lane.b32.xlu0 %v3345_v1, %s3139_s6 }
 0x418   :  { %v3059_v47 = vpop.eup %3058 }
 0x419   :  { %v667_v49 = vmul.f32 %v3059_v47, %v3045_v11  ;;  %v3061_v53 = vpop.eup %3060 }
 0x41a   :  { %v655_v54 = vsel %vm585_vm3, %v3061_v53, 0.0 }
 0x41b   :  { %v674_v51 = vpack.c.bf16 %v667_v49, %v666_v48 }
 0x41d   :  { %2713 = vmatmul.mubr.msk.bf16.vlgmr.msra.gmra.mxu1 %vm585_vm3, %v674_v51 }
 0x41e   :  { %2724 = vmatprep.mubr.msk.bf16.mxu1 %vm3137_vm1, %v3136_v14 }
 0x431   :  { %656 = vadd.xlane.f32.xlu1 %v655_v54 }
 0x442   :  { %2927 = vrot.lane.b32.xlu1 %v3345_v1, %s3786_s9 }
 0x47d   :  { %v642_v55 = vpop.xlane.xlu0 %641 }
 0x47e   :  { %3062 = vrcp.f32 %v642_v55 }
 0x481   :  { %v645_v56 = vpop.xlane.xlu1 %644 }
 0x482   :  { %3064 = vrcp.f32 %v645_v56 }
 0x485   :  { %v648_v57 = vpop.xlane.xlu0 %647  ;;  %v651_v58 = vpop.xlane.xlu1 %650 }
 0x486   :  { %3066 = vrcp.f32 %v648_v57 }
 0x487   :  { %3068 = vrcp.f32 %v651_v58 }
 0x489   :  { %v654_v59 = vpop.xlane.xlu0 %653  ;;  %v2923_v60 = vpop.permute.xlu1 %2922 }
 0x48a   :  { %v2925_v61 = vunpack.i.h.bf16 %v2923_v60  ;;  %v2924_v62 = vunpack.i.l.bf16 %v2923_v60  ;;  %3070 = vrcp.f32 %v654_v59 }
 0x48b   :  { %v3063_v2 = vpop.eup %3062 }
 0x48c   :  { %v394_v63 = vpack.c.bf16 %v2925_v61, %v2924_v62  ;;  %v668_v6 = vmul.f32 %v3063_v2, %v3047_v29 }
 0x48d   :  { %v2918_v0 = vpop.permute.xlu0 %2917 }
 0x48e   :  { %v2920_v3 = vunpack.i.h.bf16 %v2918_v0  ;;  %v2919_v4 = vunpack.i.l.bf16 %v2918_v0  ;;  %2723 = vmatpush3.bf16.msra.mxu1 %v394_v63 }
 0x48f   :  { %v3065_v5 = vpop.eup %3064  ;;  %2734 = vmatprep.subr.bf16.mxu1 %v3136_v14 }
 0x490   :  { %v393_v1 = vpack.c.bf16 %v2920_v3, %v2919_v4  ;;  %v669_v7 = vmul.f32 %v3065_v5, %v3049_v32  ;;  %v2482_v3 = vld [vmem:[%s3762_s11] ss:$0 sm:$0xff] }
 0x492   :  { %2717 = vmatpush3.bf16.msra.mxu0 %v393_v1  ;;  %v675_v9 = vpack.c.bf16 %v669_v7, %v668_v6 }
 0x493   :  { %v3067_v8 = vpop.eup %3066  ;;  %2728 = vmatprep.subr.bf16.mxu0 %v3136_v14 }
 0x494   :  { %v3069_v10 = vpop.eup %3068  ;;  %v670_v11 = vmul.f32 %v3067_v8, %v3053_v38 }
 0x495   :  { %2719 = vmatmul.mubr.msk.bf16.vlgmr.msra.gmra.mxu0 %vm585_vm3, %v675_v9  ;;  %v671_v12 = vmul.f32 %v3069_v10, %v3051_v37 }
 0x496   :  { %2730 = vmatprep.mubr.msk.bf16.mxu0 %vm3137_vm1, %v3136_v14 }
 0x497   :  { %v676_v13 = vpack.c.bf16 %v671_v12, %v670_v11  ;;  %v3071_v20 = vpop.eup %3070 }
 0x498   :  { %v672_v22 = vmul.f32 %v3071_v20, %v3403_v41 }
 0x499   :  { %2725 = vmatmul.mubr.msk.bf16.vlgmr.msra.gmra.mxu1 %vm585_vm3, %v676_v13 }
 0x49a   :  { %2738 = vmatprep.mubr.msk.bf16.mxu1 %vm3137_vm1, %v3136_v14  ;;  %2735 = vmatpush3.bf16.msra.mxu1 %v3012_v31 }
 0x49b   :  { %2736 = vmatprep.subr.bf16.mxu1 %v3136_v14 }
 0x49e   :  { %2737 = vmatpush3.bf16.msra.mxu1 %v3013_v44 }
 0x49f   :  { %2750 = vmatprep.subr.bf16.mxu1 %v3136_v14 }
 0x4ba   :  { %v657_v15 = vpop.xlane.xlu1 %656 }
 0x4bb   :  { %3072 = vrcp.f32 %v657_v15 }
 0x4be   :  { %v2928_v16 = vpop.permute.xlu1 %2927 }
 0x4bf   :  { %v2930_v17 = vunpack.i.h.bf16 %v2928_v16  ;;  %v2929_v18 = vunpack.i.l.bf16 %v2928_v16 }
 0x4c1   :  { %v395_v19 = vpack.c.bf16 %v2930_v17, %v2929_v18 }
 0x4c3   :  { %2729 = vmatpush3.bf16.msra.mxu0 %v395_v19 }
 0x4c4   :  { %2742 = vmatprep.subr.bf16.mxu0 %v3136_v14 }
 0x4c8   :  { %v3073_v21 = vpop.eup %3072 }
 0x4c9   :  { %v673_v23 = vmul.f32 %v3073_v21, %v3061_v53 }
 0x4cb   :  { %v677_v24 = vpack.c.bf16 %v673_v23, %v672_v22  ;;  %v3015_v23 = vld [vmem:[%s3763_s14] sm:$0xff]  }
 0x4cd   :  { %2731 = vmatmul.mubr.msk.bf16.vlgmr.msra.gmra.mxu0 %vm585_vm3, %v677_v24 }
 0x4ce   :  { %2746 = vmatprep.mubr.msk.bf16.mxu0 %vm3137_vm1, %v3136_v14 }
 0x4dd   :  { %v715_v25 = vpop.f32.mrf.mxu1 }
 0x4df   :  { %v2714_v26 = vpop.f32.mrf.mxu1 }
 0x4e1   :  { %v718_v27 = vpop.f32.mrf.mxu1 }
 0x4e3   :  { %v2715_v28 = vpop.f32.mrf.mxu1 }
 0x555   :  { %v759_v29 = vpop.f32.mrf.mxu0 }
 0x557   :  { %v2720_v32 = vpop.f32.mrf.mxu0 }
 0x559   :  { %v803_v35 = vpop.f32.mrf.mxu1  ;;  %v762_v37 = vpop.f32.mrf.mxu0 }
 0x55a   :  { %v2931_v38 = vpack.i.bf16 %v762_v37, %v759_v29 }
 0x55b   :  { %v2726_v39 = vpop.f32.mrf.mxu1  ;;  %v2721_v40 = vpop.f32.mrf.mxu0 }
 0x55c   :  { %2932 = vrot.lane.b32.xlu1 %v2931_v38, %s3785_s2  ;;  %v2487_v40 = vld [vmem:[%s3765_s13] ss:$0 sm:$0xff] }
 0x55d   :  { %v806_v41 = vpop.f32.mrf.mxu1 }
 0x55e   :  { %v2936_v42 = vpack.i.bf16 %v806_v41, %v803_v35  ;;  %v2486_v35 = vld [vmem:[%s3764_s12] ss:$0 sm:$0xff] }
 0x55f   :  { %v2727_v43 = vpop.f32.mrf.mxu1 }
 0x560   :  { %2937 = vrot.lane.b32.xlu0 %v2936_v42, %s3784_s4  ;;  %s3810_s4 = smov 8  }
 0x58d   :  { %v847_v45 = vpop.f32.mrf.mxu0 }
 0x58f   :  { %v2732_v46 = vpop.f32.mrf.mxu0 }
 0x590   :  { %v3017_v46 = vld [vmem:[%s3766_s16 + $0x10] sm:$0xff]  }
 0x591   :  { %v850_v47 = vpop.f32.mrf.mxu0 }
 0x592   :  { %v2941_v48 = vpack.i.bf16 %v850_v47, %v847_v45  ;;  %v3016_v45 = vld [vmem:[%s3766_s16 + $0x18] sm:$0xff]   ;;  %v3018_v47 = vld [vmem:[%s3766_s16 + $0x8] sm:$0xff]  }
 0x593   :  { %v2733_v49 = vpop.f32.mrf.mxu0 }
 0x594   :  { %2942 = vrot.lane.b32.xlu1 %v2941_v48, %s3783_s29  ;;  %v3019_v48 = vld [vmem:[%s3766_s16] sm:$0xff]  }
 0x595   :  { %v2488_v49 = vld [vmem:[%s3767_s15] ss:$0 sm:$0xff] }
 0x5ce   :  { %v2933_v50 = vpop.permute.xlu1 %2932 }
 0x5cf   :  { %v2935_v52 = vunpack.i.h.bf16 %v2933_v50  ;;  %v2934_v53 = vunpack.i.l.bf16 %v2933_v50 }
 0x5d1   :  { %v879_v57 = vsel %vm396_vm2, %v718_v27, %v2935_v52  ;;  %v878_v58 = vsel %vm396_vm2, %v715_v25, %v2934_v53 }
 0x5d2   :  { %v2938_v51 = vpop.permute.xlu0 %2937 }
 0x5d3   :  { %v2940_v54 = vunpack.i.h.bf16 %v2938_v51  ;;  %v2939_v55 = vunpack.i.l.bf16 %v2938_v51 }
 0x5d5   :  { %v880_v61 = vsel %vm585_vm3, %v878_v58, %v2939_v55  ;;  %v881_v62 = vsel %vm585_vm3, %v879_v57, %v2940_v54 }
 0x606   :  { %v2943_v56 = vpop.permute.xlu1 %2942 }
 0x607   :  { %v2945_v59 = vunpack.i.h.bf16 %v2943_v56  ;;  %v2944_v60 = vunpack.i.l.bf16 %v2943_v56 }
 0x609   :  { %v884_v63 = vsel %vm882_vm4, %v881_v62, %v2945_v59  ;;  %v883_v0 = vsel %vm882_vm4, %v880_v61, %v2944_v60 }
 0x60a   :  { %v890_v2 = vpack.c.bf16 %v884_v63, %v883_v0 }
 0x60c   :  { %2739 = vmatmul.mubr.msk.bf16.vlgmr.msra.gmra.mxu1 %vm82_vm0, %v890_v2 }
 0x60d   :  { %2758 = vmatprep.mubr.msk.bf16.mxu1 %vm3137_vm1, %v3136_v14  ;;  %2751 = vmatpush3.bf16.msra.mxu1 %v3016_v45 }
 0x60e   :  { %2752 = vmatprep.subr.bf16.mxu1 %v3136_v14 }
 0x611   :  { %2753 = vmatpush3.bf16.msra.mxu1 %v3017_v46 }
 0x612   :  { %2754 = vmatprep.subr.bf16.mxu1 %v3136_v14 }
 0x615   :  { %2755 = vmatpush3.bf16.msra.mxu1 %v3018_v47  ;;  %v2498_v47 = vld [vmem:[%s3769_s18] ss:$0 sm:$0xff] }
 0x616   :  { %2756 = vmatprep.subr.bf16.mxu1 %v3136_v14 }
 0x619   :  { %2757 = vmatpush3.bf16.msra.mxu1 %v3019_v48 }
 0x61a   :  { %2778 = vmatprep.subr.bf16.mxu1 %v3136_v14 }
 0x6cc   :  { %v946_v4 = vpop.f32.mrf.mxu1 }
 0x6cd   :  { %v947_v5 = vadd.f32 %v2482_v3, %v946_v4 }
 0x6ce   :  { %v2740_v1 = vpop.f32.mrf.mxu1 }
 0x6cf   :  { %v953_v6 = vadd.f32 %v947_v5, %v3307_v33 }
 0x6d0   :  { %v949_v7 = vpop.f32.mrf.mxu1 }
 0x6d1   :  { %v950_v8 = vadd.f32 %v2482_v3, %v949_v7  ;;  %v957_v9 = vsel %vm82_vm0, %v953_v6, 0.0 }
 0x6d2   :  { %958 = vadd.xlane.f32.xlu0 %v957_v9  ;;  %v2741_v10 = vpop.f32.mrf.mxu1 }
 0x6d3   :  { %v954_v11 = vadd.f32 %v950_v8, %v3309_v34  ;;  %v3014_v34 = vld [vmem:[%s3763_s14 + $0x8] sm:$0xff]  }
 0x6d4   :  { %2743 = vmatpush3.bf16.msra.mxu0 %v3014_v34 }
 0x6d5   :  { %v960_v12 = vsel %vm82_vm0, %v954_v11, 0.0  ;;  %2744 = vmatprep.subr.bf16.mxu0 %v3136_v14 }
 0x6d6   :  { %961 = vadd.xlane.f32.xlu1 %v960_v12 }
 0x6d8   :  { %2745 = vmatpush3.bf16.msra.mxu0 %v3015_v23 }
 0x6d9   :  { %2762 = vmatprep.subr.bf16.mxu0 %v3136_v14 }
 0x75b   :  { %v959_v13 = vpop.xlane.xlu0 %958 }
 0x75c   :  { %v963_v15 = vmul.f32 0.03125, %v959_v13 }
 0x75e   :  { %v965_v16 = vsub.f32 %v953_v6, %v963_v15 }
 0x75f   :  { %v962_v17 = vpop.xlane.xlu1 %961 }
 0x760   :  { %v964_v18 = vmul.f32 0.03125, %v962_v17  ;;  %v967_v19 = vmul.f32 %v965_v16, %v965_v16 }
 0x762   :  { %v966_v20 = vsub.f32 %v954_v11, %v964_v18  ;;  %v969_v33 = vsel %vm82_vm0, %v967_v19, 0.0  ;;  %v2492_v11 = vld [vmem:[%s3768_s17] ss:$0 sm:$0xff] }
 0x763   :  { %970 = vadd.xlane.f32.xlu0 %v969_v33 }
 0x764   :  { %v968_v21 = vmul.f32 %v966_v20, %v966_v20 }
 0x766   :  { %v972_v22 = vsel %vm82_vm0, %v968_v21, 0.0 }
 0x767   :  { %973 = vadd.xlane.f32.xlu0 %v972_v22 }
 0x7ec   :  { %v971_v24 = vpop.xlane.xlu0 %970 }
 0x7ed   :  { %v975_v25 = vmul.f32 0.03125, %v971_v24 }
 0x7ef   :  { %v977_v26 = vadd.f32 1e-12, %v975_v25 }
 0x7f0   :  { %v974_v27 = vpop.xlane.xlu0 %973 }
 0x7f1   :  { %3074 = vrsqrt.f32 %v977_v26  ;;  %v976_v28 = vmul.f32 0.03125, %v974_v27 }
 0x7f3   :  { %v978_v29 = vadd.f32 1e-12, %v976_v28 }
 0x7f5   :  { %3076 = vrsqrt.f32 %v978_v29 }
 0x7fe   :  { %v3075_v31 = vpop.eup %3074 }
 0x7ff   :  { %v981_v32 = vmul.f32 %v3075_v31, %v965_v16 }
 0x801   :  { %v989_v39 = vmul.f32 %v2486_v35, %v981_v32  ;;  %v3020_v32 = vld [vmem:[%s3800_s0 + $0x18] sm:$0xff]  }
 0x802   :  { %v3077_v37 = vpop.eup %3076 }
 0x803   :  { %v982_v38 = vmul.f32 %v3077_v37, %v966_v20  ;;  %v997_v42 = vadd.f32 %v2487_v40, %v989_v39  ;;  %v3022_v37 = vld [vmem:[%s3800_s0 + $0x10] sm:$0xff]  }
 0x805   :  { %v990_v41 = vmul.f32 %v2486_v35, %v982_v38  ;;  %v3021_v35 = vld [vmem:[%s3804_s30 + $0x18] sm:$0xff]   ;;  %v3023_v38 = vld [vmem:[%s3804_s30 + $0x10] sm:$0xff]  }
 0x807   :  { %v998_v43 = vadd.f32 %v2487_v40, %v990_v41 }
 0x809   :  { %v1004_v44 = vpack.c.bf16 %v998_v43, %v997_v42 }
 0x80b   :  { %2747 = vmatmul.mubr.msk.bf16.vlgmr.msra.gmra.mxu0 %vm82_vm0, %v1004_v44 }
 0x80c   :  { %2766 = vmatprep.mubr.msk.bf16.mxu0 %vm3137_vm1, %v3136_v14  ;;  %2763 = vmatpush3.bf16.msra.mxu0 %v3020_v32 }
 0x80d   :  { %2764 = vmatprep.subr.bf16.mxu0 %v3136_v14 }
 0x810   :  { %2765 = vmatpush3.bf16.msra.mxu0 %v3022_v37 }
 0x811   :  { %2770 = vmatprep.subr.bf16.mxu0 %v3136_v14 }
 0x8cb   :  { %v1060_v50 = vpop.f32.mrf.mxu0 }
 0x8cc   :  { %v1061_v51 = vadd.f32 %v2488_v49, %v1060_v50 }
 0x8cd   :  { %v2748_v52 = vpop.f32.mrf.mxu0 }
 0x8ce   :  { %v1067_v53 = vmul.f32 %v1061_v51, %v1061_v51 }
 0x8cf   :  { %v1063_v54 = vpop.f32.mrf.mxu0 }
 0x8d0   :  { %v1069_v55 = vmul.f32 %v1067_v53, %v1061_v51  ;;  %v1064_v56 = vadd.f32 %v2488_v49, %v1063_v54 }
 0x8d1   :  { %v2749_v57 = vpop.f32.mrf.mxu0 }
 0x8d2   :  { %v1071_v58 = vmul.f32 0.044715, %v1069_v55  ;;  %v1068_v59 = vmul.f32 %v1064_v56, %v1064_v56  ;;  %v3024_v55 = vld [vmem:[%s3801_s8 + $0x18] sm:$0xff]   ;;  %v3025_v57 = vld [vmem:[%s3801_s8 + $0x10] sm:$0xff]  }
 0x8d4   :  { %v1073_v60 = vadd.f32 %v1071_v58, %v1061_v51  ;;  %v1070_v61 = vmul.f32 %v1068_v59, %v1064_v56 }
 0x8d6   :  { %v1075_v62 = vmul.f32 0.7978846, %v1073_v60  ;;  %v1072_v63 = vmul.f32 0.044715, %v1070_v61  ;;  %v2505_v60 = vld [vmem:[%s3806_s28 + $0x1] ss:$0 sm:$0xff] }
 0x8d8   :  { %3078 = vtanh.f32 %v1075_v62  ;;  %v1074_v0 = vadd.f32 %v1072_v63, %v1064_v56  ;;  %v2523_v63 = vld [vmem:[%s3807_s25 + $0x1] ss:$0 sm:$0xff]  ;;  %s3808_s25 = smov 112  }
 0x8da   :  { %v1076_v2 = vmul.f32 0.7978846, %v1074_v0 }
 0x8dc   :  { %3080 = vtanh.f32 %v1076_v2 }
 0x8e5   :  { %v3079_v3 = vpop.eup %3078 }
 0x8e6   :  { %v1079_v4 = vadd.f32 1.0, %v3079_v3 }
 0x8e8   :  { %v1081_v1 = vmul.f32 0.5, %v1079_v4 }
 0x8e9   :  { %v3081_v5 = vpop.eup %3080 }
 0x8ea   :  { %v1080_v6 = vadd.f32 1.0, %v3081_v5  ;;  %v1083_v8 = vmul.f32 %v1081_v1, %v1061_v51  ;;  %v2499_v51 = vld [vmem:[%s3770_s19] ss:$0 sm:$0xff] }
 0x8ec   :  { %v1082_v7 = vmul.f32 0.5, %v1080_v6 }
 0x8ee   :  { %v1084_v9 = vmul.f32 %v1082_v7, %v1064_v56 }
 0x8f0   :  { %v1094_v10 = vpack.c.bf16 %v1084_v9, %v1083_v8 }
 0x8f2   :  { %2759 = vmatmul.mubr.msk.bf16.vlgmr.msra.gmra.mxu1 %vm1125_vm5, %v1094_v10 }
 0x8f3   :  { %2782 = vmatprep.mubr.msk.bf16.mxu1 %vm3137_vm1, %v3136_v14  ;;  %2779 = vmatpush3.bf16.msra.mxu1 %v3021_v35 }
 0x8f4   :  { %2780 = vmatprep.subr.bf16.mxu1 %v3136_v14 }
 0x8f7   :  { %2781 = vmatpush3.bf16.msra.mxu1 %v3023_v38 }
 0x8f8   :  { %2792 = vmatprep.subr.bf16.mxu1 %v3136_v14 }
 0x9b2   :  { %v1163_v12 = vpop.f32.mrf.mxu1 }
 0x9b3   :  { %v1164_v13 = vadd.f32 %v2492_v11, %v1163_v12  ;;  %v2514_v12 = vld [vmem:[%s3805_s3 + $0x1] ss:$0 sm:$0xff] }
 0x9b4   :  { %v2760_v15 = vpop.f32.mrf.mxu1 }
 0x9b5   :  { %v1170_v16 = vadd.f32 %v1164_v13, %v997_v42 }
 0x9b6   :  { %v1166_v17 = vpop.f32.mrf.mxu1 }
 0x9b7   :  { %v1167_v18 = vadd.f32 %v2492_v11, %v1166_v17  ;;  %v1174_v19 = vsel %vm82_vm0, %v1170_v16, 0.0 }
 0x9b8   :  { %1175 = vadd.xlane.f32.xlu0 %v1174_v19  ;;  %v2761_v20 = vpop.f32.mrf.mxu1 }
 0x9b9   :  { %v1171_v33 = vadd.f32 %v1167_v18, %v998_v43 }
 0x9bb   :  { %v1177_v21 = vsel %vm82_vm0, %v1171_v33, 0.0 }
 0x9bc   :  { %1178 = vadd.xlane.f32.xlu1 %v1177_v21 }
 0xa41   :  { %v1176_v22 = vpop.xlane.xlu0 %1175 }
 0xa42   :  { %v1180_v34 = vmul.f32 0.03125, %v1176_v22 }
 0xa44   :  { %v1182_v23 = vsub.f32 %v1170_v16, %v1180_v34 }
 0xa45   :  { %v1179_v24 = vpop.xlane.xlu1 %1178 }
 0xa46   :  { %v1181_v25 = vmul.f32 0.03125, %v1179_v24  ;;  %v1184_v26 = vmul.f32 %v1182_v23, %v1182_v23 }
 0xa48   :  { %v1183_v27 = vsub.f32 %v1171_v33, %v1181_v25  ;;  %v1186_v28 = vsel %vm82_vm0, %v1184_v26, 0.0 }
 0xa49   :  { %1187 = vadd.xlane.f32.xlu0 %v1186_v28 }
 0xa4a   :  { %v1185_v29 = vmul.f32 %v1183_v27, %v1183_v27 }
 0xa4c   :  { %v1189_v31 = vsel %vm82_vm0, %v1185_v29, 0.0 }
 0xa4d   :  { %1190 = vadd.xlane.f32.xlu1 %v1189_v31 }
 0xad2   :  { %v1188_v39 = vpop.xlane.xlu0 %1187 }
 0xad3   :  { %v1192_v40 = vmul.f32 0.03125, %v1188_v39 }
 0xad5   :  { %v1194_v41 = vadd.f32 1e-12, %v1192_v40 }
 0xad6   :  { %v1191_v42 = vpop.xlane.xlu1 %1190 }
 0xad7   :  { %3082 = vrsqrt.f32 %v1194_v41  ;;  %v1193_v43 = vmul.f32 0.03125, %v1191_v42 }
 0xad9   :  { %v1195_v44 = vadd.f32 1e-12, %v1193_v43 }
 0xadb   :  { %3084 = vrsqrt.f32 %v1195_v44 }
 0xae4   :  { %v3083_v45 = vpop.eup %3082 }
 0xae5   :  { %v1198_v46 = vmul.f32 %v3083_v45, %v1182_v23 }
 0xae7   :  { %v1206_v50 = vmul.f32 %v2498_v47, %v1198_v46 }
 0xae8   :  { %v3085_v48 = vpop.eup %3084 }
 0xae9   :  { %v1199_v49 = vmul.f32 %v3085_v48, %v1183_v27  ;;  %v3528_v53 = vadd.f32 %v2499_v51, %v1206_v50 }
 0xaeb   :  { %v1207_v52 = vmul.f32 %v2498_v47, %v1199_v49 }
 0xaed   :  { %v3530_v54 = vadd.f32 %v2499_v51, %v1207_v52 }
 0xaef   :  { %v1223_v56 = vpack.c.bf16 %v3530_v54, %v3528_v53 }
 0xaf1   :  { %2767 = vmatmul.mubr.msk.bf16.vlgmr.msra.gmra.mxu0 %vm82_vm0, %v1223_v56  ;;  %2783 = vmatmul.mubr.msk.bf16.vlgmr.msra.gmra.mxu1 %vm82_vm0, %v1223_v56 }
 0xaf2   :  { %2771 = vmatpush3.bf16.msra.mxu0 %v3024_v55  ;;  %2774 = vmatprep.mubr.msk.bf16.mxu0 %vm3137_vm1, %v3136_v14 }
 0xaf3   :  { %2772 = vmatprep.subr.bf16.mxu0 %v3136_v14  ;;  %2794 = vmatprep.mubr.msk.bf16.mxu1 %vm3137_vm1, %v3136_v14 }
 0xaf6   :  { %2773 = vmatpush3.bf16.msra.mxu0 %v3025_v57 }
 0xaf7   :  { %2786 = vmatprep.subr.bf16.mxu0 %v3136_v14 }
 0xaf9   :  { %2775 = vmatmul.mubr.msk.bf16.vlgmr.msra.gmra.mxu0 %vm82_vm0, %v1223_v56 }
 0xafa   :  { %2788 = vmatprep.mubr.msk.bf16.mxu0 %vm3137_vm1, %v3136_v14 }
 0xbb1   :  { %v1279_v58 = vpop.f32.mrf.mxu0  ;;  %v1411_v59 = vpop.f32.mrf.mxu1 }
 0xbb2   :  { %v1280_v3 = vadd.f32 %v2505_v60, %v1279_v58  ;;  %v1412_v1 = vadd.f32 %v2523_v63, %v1411_v59 }
 0xbb3   :  { %v2768_v61 = vpop.f32.mrf.mxu0  ;;  %v2784_v62 = vpop.f32.mrf.mxu1 }
 0xbb5   :  { %v1282_v0 = vpop.f32.mrf.mxu0  ;;  %v1414_v2 = vpop.f32.mrf.mxu1 }
 0xbb6   :  { %v1283_v4 = vadd.f32 %v2505_v60, %v1282_v0  ;;  %v1415_v5 = vadd.f32 %v2523_v63, %v1414_v2  ;;  %v3134_v0 = vld [vmem:[%s3760_s1] sm:$0xff] }
 0xbb7   :  { %v2769_v6 = vpop.f32.mrf.mxu0  ;;  %v2785_v7 = vpop.f32.mrf.mxu1 }
 0xbb8   :  { %v2951_v8 = vpack.i.bf16 %v1283_v4, %v1280_v3  ;;  %v1486_v10 = vpack.c.bf16 %v1415_v5, %v1412_v1  ;;  %v3557_v11 = vpack.i.bf16 %v1415_v5, %v1412_v1  ;;  %v1438_v21 = vpack.c.bf16 %v1283_v4, %v1280_v3 }
 0xbb9   :  { %v1345_v9 = vpop.f32.mrf.mxu0 }
 0xbba   :  { %2952 = vrot.lane.b32.xlu1 %v2951_v8, %s3139_s6  ;;  %v1346_v16 = vadd.f32 %v2514_v12, %v1345_v9 }
 0xbbb   :  { %v2776_v13 = vpop.f32.mrf.mxu0 }
 0xbbd   :  { %v1348_v15 = vpop.f32.mrf.mxu0 }
 0xbbe   :  { %v1349_v17 = vadd.f32 %v2514_v12, %v1348_v15 }
 0xbbf   :  { %v2777_v18 = vpop.f32.mrf.mxu0 }
 0xbc0   :  { %v2956_v19 = vpack.i.bf16 %v1349_v17, %v1346_v16  ;;  %v1462_v20 = vpack.c.bf16 %v1349_v17, %v1346_v16 }
 0xbc2   :  { %2957 = vrot.lane.b32.xlu1 %v2956_v19, %s3808_s25  ;;  %2947 = vrot.lane.b32.xlu0 %v2956_v19, %s3139_s6  ;;  %v1494_v33 = vsel %vm396_vm2, %v1462_v20, 0 }
 0xbc3   :  { %2787 = vmatpush3.bf16.xpose.msra.mxu0 %v1494_v33 }
 0xbc4   :  { %2798 = vmatprep.subr.bf16.mxu0 %v3136_v14 }
 0xbc6   :  { %2962 = vrot.lane.b32.xlu1 %v2956_v19, %s3809_s7  ;;  %2967 = vrot.lane.b32.xlu0 %v2951_v8, %s3808_s25 }
 0xbca   :  { %2972 = vrot.lane.b32.xlu1 %v2951_v8, %s3809_s7  ;;  %2789 = vmatmul.mubr.msk.bf16.vlgmr.msra.gmra.mxu0 %vm396_vm2, %v1438_v21 }
 0xbcb   :  { %2800 = vmatprep.mubr.msk.bf16.mxu0 %vm3137_vm1, %v3136_v14 }
 0xc2c   :  { %v2953_v22 = vpop.permute.xlu1 %2952 }
 0xc2d   :  { %v2955_v40 = vunpack.i.h.bf16 %v2953_v22  ;;  %v2954_v41 = vunpack.i.l.bf16 %v2953_v22 }
 0xc2f   :  { %v1439_v45 = vpack.c.bf16 %v2955_v40, %v2954_v41 }
 0xc34   :  { %v2958_v34 = vpop.permute.xlu1 %2957  ;;  %v2948_v23 = vpop.permute.xlu0 %2947 }
 0xc35   :  { %v2960_v24 = vunpack.i.h.bf16 %v2958_v34  ;;  %v2959_v25 = vunpack.i.l.bf16 %v2958_v34  ;;  %v2950_v26 = vunpack.i.h.bf16 %v2948_v23  ;;  %v2949_v27 = vunpack.i.l.bf16 %v2948_v23 }
 0xc37   :  { %v1464_v28 = vpack.c.bf16 %v2960_v24, %v2959_v25  ;;  %v1463_v29 = vpack.c.bf16 %v2950_v26, %v2949_v27 }
 0xc38   :  { %v2963_v31 = vpop.permute.xlu1 %2962  ;;  %v2968_v32 = vpop.permute.xlu0 %2967 }
 0xc39   :  { %v2965_v35 = vunpack.i.h.bf16 %v2963_v31  ;;  %v2964_v37 = vunpack.i.l.bf16 %v2963_v31  ;;  %v1541_v38 = vsel %vm396_vm2, %v1463_v29, 0  ;;  %v1588_v39 = vsel %vm396_vm2, %v1464_v28, 0 }
 0xc3a   :  { %2793 = vmatpush3.bf16.xpose.msra.mxu1 %v1541_v38  ;;  %2799 = vmatpush3.bf16.xpose.msra.mxu0 %v1588_v39  ;;  %v2970_v42 = vunpack.i.h.bf16 %v2968_v32  ;;  %v2969_v43 = vunpack.i.l.bf16 %v2968_v32 }
 0xc3b   :  { %2804 = vmatprep.subr.bf16.mxu1 %v3136_v14  ;;  %2810 = vmatprep.subr.bf16.mxu0 %v3136_v14  ;;  %v1465_v44 = vpack.c.bf16 %v2965_v35, %v2964_v37 }
 0xc3c   :  { %v1440_v46 = vpack.c.bf16 %v2970_v42, %v2969_v43  ;;  %v2973_v47 = vpop.permute.xlu1 %2972 }
 0xc3d   :  { %v1635_v48 = vsel %vm396_vm2, %v1465_v44, 0  ;;  %v2975_v49 = vunpack.i.h.bf16 %v2973_v47  ;;  %v2974_v50 = vunpack.i.l.bf16 %v2973_v47 }
 0xc3f   :  { %v1441_v51 = vpack.c.bf16 %v2975_v49, %v2974_v50 }
 0xc41   :  { %2795 = vmatmul.mubr.msk.bf16.vlgmr.msra.gmra.mxu1 %vm396_vm2, %v1439_v45  ;;  %2801 = vmatmul.mubr.msk.bf16.vlgmr.msra.gmra.mxu0 %vm396_vm2, %v1440_v46 }
 0xc42   :  { %2805 = vmatpush3.bf16.xpose.msra.mxu1 %v1635_v48  ;;  %2811 = vmatpush3.bf16.msra.mxu0 %v1486_v10 }
 0xc43   :  { %2806 = vmatprep.mubr.msk.bf16.mxu1 %vm3137_vm1, %v3136_v14  ;;  %2812 = vmatprep.mubr.msk.bf16.mxu0 %vm3137_vm1, %v3136_v14 }
 0xc44   :  { %2822 = vmatprep.subr.bf16.mxu0 %v3136_v14  ;;  %2816 = vmatprep.subr.bf16.mxu1 %v3136_v14 }
 0xc49   :  { %2807 = vmatmul.mubr.msk.bf16.vlgmr.msra.gmra.mxu1 %vm396_vm2, %v1441_v51 }
 0xc4a   :  { %2818 = vmatprep.mubr.msk.bf16.mxu1 %vm3137_vm1, %v3136_v14 }
 0xc8a   :  { %v1530_v52 = vpop.f32.mrf.mxu0 }
 0xc8b   :  { %v1531_v55 = vadd.f32 %v1530_v52, %v3371_v30 }
 0xc8c   :  { %v2790_v56 = vpop.f32.mrf.mxu0 }
 0xc8d   :  { %v1678_v57 = vsel %vm585_vm3, %v1531_v55, -inf }
 0xc8e   :  { %1679 = vmax.xlane.f32.xlu0 %v1678_v57  ;;  %v1533_v58 = vpop.f32.mrf.mxu0 }
 0xc8f   :  { %v1534_v59 = vadd.f32 %v1533_v58, %v3377_v36  ;;  %v3135_v36 = vld [vmem:[%s3760_s1 + $0x8] sm:$0xff] }
 0xc90   :  { %v2791_v60 = vpop.f32.mrf.mxu0 }
 0xc91   :  { %v1681_v61 = vsel %vm585_vm3, %v1534_v59, -inf }
 0xc92   :  { %1682 = vmax.xlane.f32.xlu1 %v1681_v61 }
 0xd01   :  { %v1577_v62 = vpop.f32.mrf.mxu1  ;;  %v1624_v63 = vpop.f32.mrf.mxu0 }
 0xd02   :  { %v1578_v2 = vadd.f32 %v3134_v0, %v1577_v62  ;;  %v1625_v10 = vadd.f32 %v3134_v0, %v1624_v63 }
 0xd03   :  { %v2796_v3 = vpop.f32.mrf.mxu1  ;;  %v2802_v30 = vpop.f32.mrf.mxu0 }
 0xd04   :  { %v1684_v4 = vsel %vm585_vm3, %v1578_v2, -inf  ;;  %v1690_v18 = vsel %vm585_vm3, %v1625_v10, -inf }
 0xd05   :  { %v1580_v5 = vpop.f32.mrf.mxu1  ;;  %1685 = vmax.xlane.f32.xlu0 %v1684_v4  ;;  %v1627_v1 = vpop.f32.mrf.mxu0 }
 0xd06   :  { %v1581_v6 = vadd.f32 %v3135_v36, %v1580_v5  ;;  %v1628_v7 = vadd.f32 %v3135_v36, %v1627_v1 }
 0xd07   :  { %v2797_v8 = vpop.f32.mrf.mxu1  ;;  %v2803_v9 = vpop.f32.mrf.mxu0 }
 0xd08   :  { %v1687_v12 = vsel %vm585_vm3, %v1581_v6, -inf  ;;  %v1693_v13 = vsel %vm585_vm3, %v1628_v7, -inf }
 0xd09   :  { %v1671_v15 = vpop.f32.mrf.mxu1  ;;  %1688 = vmax.xlane.f32.xlu0 %v1687_v12  ;;  %1694 = vmax.xlane.f32.xlu1 %v1693_v13 }
 0xd0a   :  { %v1672_v17 = vadd.f32 %v3134_v0, %v1671_v15 }
 0xd0b   :  { %v2808_v16 = vpop.f32.mrf.mxu1 }
 0xd0c   :  { %v1696_v21 = vsel %vm585_vm3, %v1672_v17, -inf }
 0xd0d   :  { %v1674_v19 = vpop.f32.mrf.mxu1  ;;  %1691 = vmax.xlane.f32.xlu0 %v1690_v18 }
 0xd0e   :  { %v3603_v20 = vadd.f32 %v3135_v36, %v1674_v19 }
 0xd0f   :  { %v2809_v33 = vpop.f32.mrf.mxu1 }
 0xd10   :  { %v1699_v22 = vsel %vm585_vm3, %v3603_v20, -inf }
 0xd11   :  { %1697 = vmax.xlane.f32.xlu0 %v1696_v21  ;;  %1700 = vmax.xlane.f32.xlu1 %v1699_v22 }
 0xd17   :  { %v1680_v34 = vpop.xlane.xlu0 %1679 }
 0xd18   :  { %v1702_v23 = vsub.f32 %v1531_v55, %v1680_v34 }
 0xd1a   :  { %v1710_v24 = vmul.f32 1.442695, %v1702_v23 }
 0xd1b   :  { %v1683_v25 = vpop.xlane.xlu1 %1682 }
 0xd1c   :  { %3086 = vpow2.f32 %v1710_v24  ;;  %v1703_v26 = vsub.f32 %v1534_v59, %v1683_v25 }
 0xd1e   :  { %v1712_v27 = vmul.f32 1.442695, %v1703_v26 }
 0xd20   :  { %3088 = vpow2.f32 %v1712_v27 }
 0xd29   :  { %v3087_v28 = vpop.eup %3086 }
 0xd2a   :  { %v1726_v29 = vsel %vm585_vm3, %v3087_v28, 0.0 }
 0xd2b   :  { %1727 = vadd.xlane.f32.xlu0 %v1726_v29 }
 0xd2d   :  { %v3089_v31 = vpop.eup %3088 }
 0xd2e   :  { %v1729_v32 = vsel %vm585_vm3, %v3089_v31, 0.0 }
 0xd2f   :  { %1730 = vadd.xlane.f32.xlu1 %v1729_v32 }
 0xd8e   :  { %v1686_v35 = vpop.xlane.xlu0 %1685 }
 0xd8f   :  { %v1704_v37 = vsub.f32 %v1578_v2, %v1686_v35 }
 0xd91   :  { %v1714_v38 = vmul.f32 1.442695, %v1704_v37 }
 0xd92   :  { %v1689_v39 = vpop.xlane.xlu0 %1688  ;;  %v1695_v40 = vpop.xlane.xlu1 %1694 }
 0xd93   :  { %3090 = vpow2.f32 %v1714_v38  ;;  %v1705_v41 = vsub.f32 %v1581_v6, %v1689_v39  ;;  %v1707_v42 = vsub.f32 %v1628_v7, %v1695_v40 }
 0xd95   :  { %v1716_v43 = vmul.f32 1.442695, %v1705_v41  ;;  %v1720_v44 = vmul.f32 1.442695, %v1707_v42 }
 0xd96   :  { %v1692_v45 = vpop.xlane.xlu0 %1691 }
 0xd97   :  { %3092 = vpow2.f32 %v1716_v43  ;;  %v1706_v46 = vsub.f32 %v1625_v10, %v1692_v45 }
 0xd98   :  { %3094 = vpow2.f32 %v1720_v44 }
 0xd99   :  { %v1718_v47 = vmul.f32 1.442695, %v1706_v46 }
 0xd9a   :  { %v1698_v48 = vpop.xlane.xlu0 %1697  ;;  %v1701_v63 = vpop.xlane.xlu1 %1700 }
 0xd9b   :  { %3096 = vpow2.f32 %v1718_v47  ;;  %v1708_v49 = vsub.f32 %v1672_v17, %v1698_v48  ;;  %v1709_v4 = vsub.f32 %v3603_v20, %v1701_v63 }
 0xd9d   :  { %v1722_v50 = vmul.f32 1.442695, %v1708_v49  ;;  %v1724_v6 = vmul.f32 1.442695, %v1709_v4 }
 0xd9f   :  { %3098 = vpow2.f32 %v1722_v50  ;;  %v3026_v50 = vld [vmem:[%s3761_s10 + $0x18] sm:$0xff]  }
 0xda0   :  { %v3091_v51 = vpop.eup %3090 }
 0xda1   :  { %v1732_v52 = vsel %vm585_vm3, %v3091_v51, 0.0 }
 0xda2   :  { %1733 = vadd.xlane.f32.xlu0 %v1732_v52 }
 0xda4   :  { %v3093_v55 = vpop.eup %3092 }
 0xda5   :  { %v1735_v56 = vsel %vm585_vm3, %v3093_v55, 0.0  ;;  %v3095_v57 = vpop.eup %3094 }
 0xda6   :  { %1736 = vadd.xlane.f32.xlu1 %v1735_v56  ;;  %v1741_v60 = vsel %vm585_vm3, %v3095_v57, 0.0 }
 0xda8   :  { %v3097_v58 = vpop.eup %3096 }
 0xda9   :  { %v1738_v59 = vsel %vm585_vm3, %v3097_v58, 0.0 }
 0xdaa   :  { %1739 = vadd.xlane.f32.xlu0 %v1738_v59  ;;  %1742 = vadd.xlane.f32.xlu1 %v1741_v60 }
 0xdac   :  { %v3614_v61 = vpop.eup %3098 }
 0xdad   :  { %v1744_v62 = vsel %vm585_vm3, %v3614_v61, 0.0 }
 0xdae   :  { %1745 = vadd.xlane.f32.xlu0 %v1744_v62  ;;  %v3027_v62 = vld [vmem:[%s3761_s10 + $0x10] sm:$0xff]  }
 0xdb4   :  { %v1728_v0 = vpop.xlane.xlu0 %1727 }
 0xdb5   :  { %3100 = vrcp.f32 %v1728_v0 }
 0xdb8   :  { %v1731_v2 = vpop.xlane.xlu1 %1730 }
 0xdb9   :  { %3102 = vrcp.f32 %v1731_v2 }
 0xdba   :  { %3104 = vpow2.f32 %v1724_v6 }
 0xdbb   :  { %2982 = vrot.lane.b32.xlu1 %v3557_v11, %s3808_s25 }
 0xdc2   :  { %v3101_v3 = vpop.eup %3100 }
 0xdc3   :  { %v1758_v5 = vmul.f32 %v3101_v3, %v3087_v28 }
 0xdc4   :  { %2977 = vrot.lane.b32.xlu0 %v3557_v11, %s3139_s6 }
 0xdc6   :  { %v3103_v30 = vpop.eup %3102 }
 0xdc7   :  { %v1759_v1 = vmul.f32 %v3103_v30, %v3089_v31  ;;  %v3105_v7 = vpop.eup %3104 }
 0xdc8   :  { %v1747_v8 = vsel %vm585_vm3, %v3105_v7, 0.0 }
 0xdc9   :  { %v1766_v36 = vpack.c.bf16 %v1759_v1, %v1758_v5 }
 0xdcb   :  { %2813 = vmatmul.mubr.msk.bf16.vlgmr.msra.gmra.mxu0 %vm585_vm3, %v1766_v36 }
 0xdcc   :  { %2824 = vmatprep.mubr.msk.bf16.mxu0 %vm3137_vm1, %v3136_v14 }
 0xddf   :  { %1748 = vadd.xlane.f32.xlu1 %v1747_v8 }
 0xdf0   :  { %2987 = vrot.lane.b32.xlu1 %v3557_v11, %s3809_s7 }
 0xe2b   :  { %v1734_v9 = vpop.xlane.xlu0 %1733 }
 0xe2c   :  { %3106 = vrcp.f32 %v1734_v9 }
 0xe2f   :  { %v1737_v10 = vpop.xlane.xlu1 %1736 }
 0xe30   :  { %3108 = vrcp.f32 %v1737_v10 }
 0xe33   :  { %v1740_v12 = vpop.xlane.xlu0 %1739  ;;  %v1743_v13 = vpop.xlane.xlu1 %1742 }
 0xe34   :  { %3110 = vrcp.f32 %v1740_v12 }
 0xe35   :  { %3112 = vrcp.f32 %v1743_v13 }
 0xe37   :  { %v1746_v15 = vpop.xlane.xlu0 %1745  ;;  %v2983_v16 = vpop.permute.xlu1 %2982 }
 0xe38   :  { %v2985_v17 = vunpack.i.h.bf16 %v2983_v16  ;;  %v2984_v18 = vunpack.i.l.bf16 %v2983_v16  ;;  %3114 = vrcp.f32 %v1746_v15 }
 0xe39   :  { %v3107_v20 = vpop.eup %3106 }
 0xe3a   :  { %v1488_v19 = vpack.c.bf16 %v2985_v17, %v2984_v18  ;;  %v1760_v23 = vmul.f32 %v3107_v20, %v3091_v51  ;;  %v2540_v20 = vld [vmem:[%s3762_s11 + $0x1] ss:$0 sm:$0xff] }
 0xe3b   :  { %v2978_v33 = vpop.permute.xlu0 %2977 }
 0xe3c   :  { %v2980_v21 = vunpack.i.h.bf16 %v2978_v33  ;;  %v2979_v22 = vunpack.i.l.bf16 %v2978_v33  ;;  %2823 = vmatpush3.bf16.msra.mxu0 %v1488_v19 }
 0xe3d   :  { %v3109_v34 = vpop.eup %3108  ;;  %2834 = vmatprep.subr.bf16.mxu0 %v3136_v14 }
 0xe3e   :  { %v1487_v11 = vpack.c.bf16 %v2980_v21, %v2979_v22  ;;  %v1761_v24 = vmul.f32 %v3109_v34, %v3093_v55 }
 0xe40   :  { %2817 = vmatpush3.bf16.msra.mxu1 %v1487_v11  ;;  %v1767_v25 = vpack.c.bf16 %v1761_v24, %v1760_v23 }
 0xe41   :  { %v3111_v26 = vpop.eup %3110  ;;  %2828 = vmatprep.subr.bf16.mxu1 %v3136_v14 }
 0xe42   :  { %v3113_v27 = vpop.eup %3112  ;;  %v1762_v28 = vmul.f32 %v3111_v26, %v3097_v58 }
 0xe43   :  { %2819 = vmatmul.mubr.msk.bf16.vlgmr.msra.gmra.mxu1 %vm585_vm3, %v1767_v25  ;;  %v1763_v29 = vmul.f32 %v3113_v27, %v3095_v57 }
 0xe44   :  { %2830 = vmatprep.mubr.msk.bf16.mxu1 %vm3137_vm1, %v3136_v14 }
 0xe45   :  { %v1768_v31 = vpack.c.bf16 %v1763_v29, %v1762_v28  ;;  %v3115_v40 = vpop.eup %3114 }
 0xe46   :  { %v1764_v42 = vmul.f32 %v3115_v40, %v3614_v61 }
 0xe47   :  { %2825 = vmatmul.mubr.msk.bf16.vlgmr.msra.gmra.mxu0 %vm585_vm3, %v1768_v31 }
 0xe48   :  { %2838 = vmatprep.mubr.msk.bf16.mxu0 %vm3137_vm1, %v3136_v14  ;;  %2835 = vmatpush3.bf16.msra.mxu0 %v3026_v50  ;;  %v2546_v50 = vld [vmem:[%s3764_s12 + $0x1] ss:$0 sm:$0xff] }
 0xe49   :  { %2836 = vmatprep.subr.bf16.mxu0 %v3136_v14 }
 0xe4c   :  { %2837 = vmatpush3.bf16.msra.mxu0 %v3027_v62  ;;  %v3031_v62 = vld [vmem:[%s3766_s16 + $0x30] sm:$0xff]  }
 0xe4d   :  { %2850 = vmatprep.subr.bf16.mxu0 %v3136_v14 }
 0xe68   :  { %v1749_v32 = vpop.xlane.xlu1 %1748 }
 0xe69   :  { %3116 = vrcp.f32 %v1749_v32 }
 0xe6c   :  { %v2988_v35 = vpop.permute.xlu1 %2987 }
 0xe6d   :  { %v2990_v37 = vunpack.i.h.bf16 %v2988_v35  ;;  %v2989_v38 = vunpack.i.l.bf16 %v2988_v35 }
 0xe6f   :  { %v1489_v39 = vpack.c.bf16 %v2990_v37, %v2989_v38 }
 0xe71   :  { %2829 = vmatpush3.bf16.msra.mxu1 %v1489_v39 }
 0xe72   :  { %2842 = vmatprep.subr.bf16.mxu1 %v3136_v14 }
 0xe76   :  { %v3117_v41 = vpop.eup %3116 }
 0xe77   :  { %v1765_v43 = vmul.f32 %v3117_v41, %v3105_v7  ;;  %v3029_v41 = vld [vmem:[%s3763_s14 + $0x10] sm:$0xff]  }
 0xe79   :  { %v1769_v44 = vpack.c.bf16 %v1765_v43, %v1764_v42 }
 0xe7b   :  { %2831 = vmatmul.mubr.msk.bf16.vlgmr.msra.gmra.mxu1 %vm585_vm3, %v1769_v44 }
 0xe7c   :  { %2846 = vmatprep.mubr.msk.bf16.mxu1 %vm3137_vm1, %v3136_v14 }
 0xe8b   :  { %v1807_v45 = vpop.f32.mrf.mxu0 }
 0xe8d   :  { %v2814_v46 = vpop.f32.mrf.mxu0 }
 0xe8f   :  { %v1810_v47 = vpop.f32.mrf.mxu0 }
 0xe91   :  { %v2815_v48 = vpop.f32.mrf.mxu0 }
 0xf03   :  { %v1851_v49 = vpop.f32.mrf.mxu1 }
 0xf05   :  { %v2820_v51 = vpop.f32.mrf.mxu1 }
 0xf07   :  { %v1895_v52 = vpop.f32.mrf.mxu0  ;;  %v1854_v55 = vpop.f32.mrf.mxu1 }
 0xf08   :  { %v2991_v56 = vpack.i.bf16 %v1854_v55, %v1851_v49 }
 0xf09   :  { %v2826_v57 = vpop.f32.mrf.mxu0  ;;  %v2821_v58 = vpop.f32.mrf.mxu1 }
 0xf0a   :  { %2992 = vrot.lane.b32.xlu1 %v2991_v56, %s3810_s4  ;;  %v2547_v56 = vld [vmem:[%s3765_s13 + $0x1] ss:$0 sm:$0xff] }
 0xf0b   :  { %v1898_v59 = vpop.f32.mrf.mxu0 }
 0xf0c   :  { %v2996_v60 = vpack.i.bf16 %v1898_v59, %v1895_v52 }
 0xf0d   :  { %v2827_v61 = vpop.f32.mrf.mxu0 }
 0xf0e   :  { %2997 = vrot.lane.b32.xlu0 %v2996_v60, %s3811_s27  ;;  %v3030_v61 = vld [vmem:[%s3766_s16 + $0x38] sm:$0xff]  }
 0xf3b   :  { %v1939_v63 = vpop.f32.mrf.mxu1 }
 0xf3d   :  { %v2832_v0 = vpop.f32.mrf.mxu1 }
 0xf3e   :  { %v3033_v0 = vld [vmem:[%s3766_s16 + $0x20] sm:$0xff]  }
 0xf3f   :  { %v1942_v2 = vpop.f32.mrf.mxu1 }
 0xf40   :  { %v3001_v3 = vpack.i.bf16 %v1942_v2, %v1939_v63  ;;  %v3032_v63 = vld [vmem:[%s3766_s16 + $0x28] sm:$0xff]   ;;  %v2553_v2 = vld [vmem:[%s3767_s15 + $0x1] ss:$0 sm:$0xff] }
 0xf41   :  { %v2833_v30 = vpop.f32.mrf.mxu1 }
 0xf42   :  { %3002 = vrot.lane.b32.xlu1 %v3001_v3, %s3812_s5 }
 0xf7c   :  { %v2993_v4 = vpop.permute.xlu1 %2992 }
 0xf7d   :  { %v2995_v1 = vunpack.i.h.bf16 %v2993_v4  ;;  %v2994_v36 = vunpack.i.l.bf16 %v2993_v4 }
 0xf7f   :  { %v1970_v9 = vsel %vm396_vm2, %v1807_v45, %v2994_v36  ;;  %v1971_v10 = vsel %vm396_vm2, %v1810_v47, %v2995_v1 }
 0xf80   :  { %v2998_v5 = vpop.permute.xlu0 %2997 }
 0xf81   :  { %v3000_v6 = vunpack.i.h.bf16 %v2998_v5  ;;  %v2999_v7 = vunpack.i.l.bf16 %v2998_v5 }
 0xf83   :  { %v1973_v15 = vsel %vm585_vm3, %v1971_v10, %v3000_v6  ;;  %v1972_v16 = vsel %vm585_vm3, %v1970_v9, %v2999_v7 }
 0xfb4   :  { %v3003_v8 = vpop.permute.xlu1 %3002 }
 0xfb5   :  { %v3005_v12 = vunpack.i.h.bf16 %v3003_v8  ;;  %v3004_v13 = vunpack.i.l.bf16 %v3003_v8 }
 0xfb7   :  { %v1974_v17 = vsel %vm882_vm4, %v1972_v16, %v3004_v13  ;;  %v1975_v18 = vsel %vm882_vm4, %v1973_v15, %v3005_v12 }
 0xfb8   :  { %v1983_v19 = vpack.c.bf16 %v1975_v18, %v1974_v17 }
 0xfba   :  { %2839 = vmatmul.mubr.msk.bf16.vlgmr.msra.gmra.mxu0 %vm82_vm0, %v1983_v19 }
 0xfbb   :  { %2858 = vmatprep.mubr.msk.bf16.mxu0 %vm3137_vm1, %v3136_v14  ;;  %2851 = vmatpush3.bf16.msra.mxu0 %v3030_v61 }
 0xfbc   :  { %2852 = vmatprep.subr.bf16.mxu0 %v3136_v14 }
 0xfbf   :  { %2853 = vmatpush3.bf16.msra.mxu0 %v3031_v62 }
 0xfc0   :  { %2854 = vmatprep.subr.bf16.mxu0 %v3136_v14 }
 0xfc3   :  { %2855 = vmatpush3.bf16.msra.mxu0 %v3032_v63  ;;  %v2575_v63 = vld [vmem:[%s3770_s19 + $0x1] ss:$0 sm:$0xff] }
 0xfc4   :  { %2856 = vmatprep.subr.bf16.mxu0 %v3136_v14 }
 0xfc7   :  { %2857 = vmatpush3.bf16.msra.mxu0 %v3033_v0 }
0x107a   :  { %v2039_v33 = vpop.f32.mrf.mxu0 }
0x107b   :  { %v2040_v21 = vadd.f32 %v2540_v20, %v2039_v33 }
0x107c   :  { %v2840_v22 = vpop.f32.mrf.mxu0 }
0x107d   :  { %v2046_v34 = vadd.f32 %v2040_v21, %v3528_v53 }
0x107e   :  { %v2042_v11 = vpop.f32.mrf.mxu0 }
0x107f   :  { %v2043_v23 = vadd.f32 %v2540_v20, %v2042_v11  ;;  %v2052_v24 = vsel %vm82_vm0, %v2046_v34, 0.0 }
0x1080   :  { %2053 = vadd.xlane.f32.xlu0 %v2052_v24  ;;  %v2841_v25 = vpop.f32.mrf.mxu0  ;;  %v2566_v24 = vld [vmem:[%s3768_s17 + $0x1] ss:$0 sm:$0xff] }
0x1081   :  { %v2047_v26 = vadd.f32 %v2043_v23, %v3530_v54  ;;  %v3028_v54 = vld [vmem:[%s3763_s14 + $0x18] sm:$0xff]  }
0x1082   :  { %2843 = vmatpush3.bf16.msra.mxu1 %v3028_v54 }
0x1083   :  { %v2055_v27 = vsel %vm82_vm0, %v2047_v26, 0.0  ;;  %2844 = vmatprep.subr.bf16.mxu1 %v3136_v14 }
0x1084   :  { %2056 = vadd.xlane.f32.xlu1 %v2055_v27 }
0x1086   :  { %2845 = vmatpush3.bf16.msra.mxu1 %v3029_v41 }
0x1087   :  { %2862 = vmatprep.subr.bf16.mxu1 %v3136_v14 }
0x1109   :  { %v2054_v28 = vpop.xlane.xlu0 %2053 }
0x110a   :  { %v2058_v29 = vmul.f32 0.03125, %v2054_v28 }
0x110c   :  { %v2060_v31 = vsub.f32 %v2046_v34, %v2058_v29 }
0x110d   :  { %v2057_v32 = vpop.xlane.xlu1 %2056 }
0x110e   :  { %v2059_v35 = vmul.f32 0.03125, %v2057_v32  ;;  %v2062_v37 = vmul.f32 %v2060_v31, %v2060_v31 }
0x1110   :  { %v2061_v38 = vsub.f32 %v2047_v26, %v2059_v35  ;;  %v2064_v53 = vsel %vm82_vm0, %v2062_v37, 0.0 }
0x1111   :  { %2065 = vadd.xlane.f32.xlu0 %v2064_v53 }
0x1112   :  { %v2063_v39 = vmul.f32 %v2061_v38, %v2061_v38 }
0x1114   :  { %v2067_v40 = vsel %vm82_vm0, %v2063_v39, 0.0 }
0x1115   :  { %2068 = vadd.xlane.f32.xlu0 %v2067_v40 }
0x119a   :  { %v2066_v42 = vpop.xlane.xlu0 %2065 }
0x119b   :  { %v2070_v43 = vmul.f32 0.03125, %v2066_v42 }
0x119d   :  { %v2072_v44 = vadd.f32 1e-12, %v2070_v43 }
0x119e   :  { %v2069_v45 = vpop.xlane.xlu0 %2068 }
0x119f   :  { %3118 = vrsqrt.f32 %v2072_v44  ;;  %v2071_v46 = vmul.f32 0.03125, %v2069_v45 }
0x11a1   :  { %v2073_v47 = vadd.f32 1e-12, %v2071_v46 }
0x11a3   :  { %3120 = vrsqrt.f32 %v2073_v47  ;;  %v3034_v47 = vld [vmem:[%s3771_s20 + $0x8] sm:$0xff]  }
0x11ac   :  { %v3119_v48 = vpop.eup %3118 }
0x11ad   :  { %v2076_v49 = vmul.f32 %v3119_v48, %v2060_v31  ;;  %v3035_v48 = vld [vmem:[%s3771_s20] sm:$0xff]  }
0x11af   :  { %v2084_v55 = vmul.f32 %v2546_v50, %v2076_v49 }
0x11b0   :  { %v3121_v51 = vpop.eup %3120 }
0x11b1   :  { %v2077_v52 = vmul.f32 %v3121_v51, %v2061_v38  ;;  %v2092_v58 = vadd.f32 %v2547_v56, %v2084_v55 }
0x11b3   :  { %v2085_v57 = vmul.f32 %v2546_v50, %v2077_v52 }
0x11b5   :  { %v2093_v59 = vadd.f32 %v2547_v56, %v2085_v57 }
0x11b7   :  { %v2101_v60 = vpack.c.bf16 %v2093_v59, %v2092_v58 }
0x11b9   :  { %2847 = vmatmul.mubr.msk.bf16.vlgmr.msra.gmra.mxu1 %vm82_vm0, %v2101_v60 }
0x11ba   :  { %2866 = vmatprep.mubr.msk.bf16.mxu1 %vm3137_vm1, %v3136_v14  ;;  %2863 = vmatpush3.bf16.msra.mxu1 %v3034_v47 }
0x11bb   :  { %2864 = vmatprep.subr.bf16.mxu1 %v3136_v14 }
0x11be   :  { %2865 = vmatpush3.bf16.msra.mxu1 %v3035_v48 }
0x11bf   :  { %2870 = vmatprep.subr.bf16.mxu1 %v3136_v14 }
0x1279   :  { %v2157_v3 = vpop.f32.mrf.mxu1 }
0x127a   :  { %v2158_v30 = vadd.f32 %v2553_v2, %v2157_v3 }
0x127b   :  { %v2848_v4 = vpop.f32.mrf.mxu1 }
0x127c   :  { %v2164_v5 = vmul.f32 %v2158_v30, %v2158_v30  ;;  %v3036_v4 = vld [vmem:[%s3772_s22 + $0x8] sm:$0xff]  }
0x127d   :  { %v2160_v1 = vpop.f32.mrf.mxu1 }
0x127e   :  { %v2166_v36 = vmul.f32 %v2164_v5, %v2158_v30  ;;  %v2161_v6 = vadd.f32 %v2553_v2, %v2160_v1  ;;  %v3037_v5 = vld [vmem:[%s3772_s22] sm:$0xff]  }
0x127f   :  { %v2849_v7 = vpop.f32.mrf.mxu1  ;;  %v2576_v1 = vld [vmem:[%s3773_s21] ss:$0 sm:$0xff] }
0x1280   :  { %v2168_v8 = vmul.f32 0.044715, %v2166_v36  ;;  %v2165_v9 = vmul.f32 %v2161_v6, %v2161_v6 }
0x1282   :  { %v2170_v10 = vadd.f32 %v2168_v8, %v2158_v30  ;;  %v2167_v12 = vmul.f32 %v2165_v9, %v2161_v6 }
0x1284   :  { %v2172_v13 = vmul.f32 0.7978846, %v2170_v10  ;;  %v2169_v15 = vmul.f32 0.044715, %v2167_v12 }
0x1286   :  { %3122 = vtanh.f32 %v2172_v13  ;;  %v2171_v16 = vadd.f32 %v2169_v15, %v2161_v6 }
0x1288   :  { %v2173_v17 = vmul.f32 0.7978846, %v2171_v16 }
0x128a   :  { %3124 = vtanh.f32 %v2173_v17 }
0x1293   :  { %v3123_v18 = vpop.eup %3122 }
0x1294   :  { %v2176_v19 = vadd.f32 1.0, %v3123_v18 }
0x1296   :  { %v2178_v33 = vmul.f32 0.5, %v2176_v19 }
0x1297   :  { %v3125_v20 = vpop.eup %3124 }
0x1298   :  { %v2177_v21 = vadd.f32 1.0, %v3125_v20  ;;  %v2180_v34 = vmul.f32 %v2178_v33, %v2158_v30 }
0x129a   :  { %v2179_v22 = vmul.f32 0.5, %v2177_v21 }
0x129c   :  { %v2181_v11 = vmul.f32 %v2179_v22, %v2161_v6 }
0x129e   :  { %v2193_v23 = vpack.c.bf16 %v2181_v11, %v2180_v34 }
0x12a0   :  { %2859 = vmatmul.mubr.msk.bf16.vlgmr.msra.gmra.mxu0 %vm1125_vm5, %v2193_v23 }
0x1360   :  { %v2261_v25 = vpop.f32.mrf.mxu0 }
0x1361   :  { %v2262_v26 = vadd.f32 %v2566_v24, %v2261_v25 }
0x1362   :  { %v2860_v27 = vpop.f32.mrf.mxu0 }
0x1363   :  { %v2268_v28 = vadd.f32 %v2262_v26, %v2092_v58 }
0x1364   :  { %v2264_v29 = vpop.f32.mrf.mxu0 }
0x1365   :  { %v2265_v31 = vadd.f32 %v2566_v24, %v2264_v29  ;;  %v2274_v32 = vsel %vm82_vm0, %v2268_v28, 0.0 }
0x1366   :  { %2275 = vadd.xlane.f32.xlu0 %v2274_v32  ;;  %v2861_v35 = vpop.f32.mrf.mxu0 }
0x1367   :  { %v2269_v37 = vadd.f32 %v2265_v31, %v2093_v59  ;;  %v2574_v59 = vld [vmem:[%s3769_s18 + $0x1] ss:$0 sm:$0xff] }
0x1369   :  { %v2277_v38 = vsel %vm82_vm0, %v2269_v37, 0.0 }
0x136a   :  { %2278 = vadd.xlane.f32.xlu1 %v2277_v38 }
0x13ef   :  { %v2276_v53 = vpop.xlane.xlu0 %2275 }
0x13f0   :  { %v2280_v39 = vmul.f32 0.03125, %v2276_v53 }
0x13f2   :  { %v2282_v40 = vsub.f32 %v2268_v28, %v2280_v39 }
0x13f3   :  { %v2279_v54 = vpop.xlane.xlu1 %2278 }
0x13f4   :  { %v2281_v41 = vmul.f32 0.03125, %v2279_v54  ;;  %v2284_v42 = vmul.f32 %v2282_v40, %v2282_v40 }
0x13f6   :  { %v2283_v43 = vsub.f32 %v2269_v37, %v2281_v41  ;;  %v2286_v44 = vsel %vm82_vm0, %v2284_v42, 0.0 }
0x13f7   :  { %2287 = vadd.xlane.f32.xlu0 %v2286_v44 }
0x13f8   :  { %v2285_v45 = vmul.f32 %v2283_v43, %v2283_v43 }
0x13fa   :  { %v2289_v46 = vsel %vm82_vm0, %v2285_v45, 0.0 }
0x13fb   :  { %2290 = vadd.xlane.f32.xlu1 %v2289_v46 }
0x1480   :  { %v2288_v49 = vpop.xlane.xlu0 %2287 }
0x1481   :  { %v2292_v50 = vmul.f32 0.03125, %v2288_v49 }
0x1483   :  { %v2294_v51 = vadd.f32 1e-12, %v2292_v50 }
0x1484   :  { %v2291_v52 = vpop.xlane.xlu1 %2290 }
0x1485   :  { %3126 = vrsqrt.f32 %v2294_v51  ;;  %v2293_v55 = vmul.f32 0.03125, %v2291_v52 }
0x1487   :  { %v2295_v56 = vadd.f32 1e-12, %v2293_v55 }
0x1489   :  { %3128 = vrsqrt.f32 %v2295_v56 }
0x1492   :  { %v3127_v57 = vpop.eup %3126 }
0x1493   :  { %v2298_v58 = vmul.f32 %v3127_v57, %v2282_v40 }
0x1495   :  { %v2306_v62 = vmul.f32 %v2574_v59, %v2298_v58 }
0x1496   :  { %v3129_v60 = vpop.eup %3128 }
0x1497   :  { %v2299_v61 = vmul.f32 %v3129_v60, %v2283_v43  ;;  %v2314_v2 = vadd.f32 %v2575_v63, %v2306_v62 }
0x1499   :  { %v2307_v0 = vmul.f32 %v2574_v59, %v2299_v61 }
0x149b   :  { %v2315_v3 = vadd.f32 %v2575_v63, %v2307_v0 }
0x149d   :  { %v2321_v30 = vpack.c.bf16 %v2315_v3, %v2314_v2 }
0x149f   :  { %2867 = vmatmul.mubr.msk.bf16.vlgmr.msra.gmra.mxu1 %vm82_vm0, %v2321_v30 }
0x14a0   :  { %2874 = vmatprep.mubr.msk.bf16.mxu1 %vm3137_vm1, %v3136_v14  ;;  %2871 = vmatpush3.bf16.msra.mxu1 %v3036_v4 }
0x14a1   :  { %2872 = vmatprep.subr.bf16.mxu1 %v3136_v14  ;;  %v2580_v14 = vld [vmem:[%s3774_s23] ss:$0 sm:$0xff] }
0x14a4   :  { %2873 = vmatpush3.bf16.msra.mxu1 %v3037_v5 }
0x155f   :  { %v2377_v36 = vpop.f32.mrf.mxu1 }
0x1560   :  { %v2378_v6 = vadd.f32 %v2576_v1, %v2377_v36 }
0x1561   :  { %v2868_v7 = vpop.f32.mrf.mxu1 }
0x1562   :  { %3130 = vtanh.f32 %v2378_v6 }
0x1563   :  { %v2380_v8 = vpop.f32.mrf.mxu1 }
0x1564   :  { %v2381_v9 = vadd.f32 %v2576_v1, %v2380_v8 }
0x1565   :  { %v2869_v10 = vpop.f32.mrf.mxu1 }
0x1566   :  { %3132 = vtanh.f32 %v2381_v9 }
0x156f   :  { %v3131_v12 = vpop.eup %3130 }
0x1573   :  { %v3133_v13 = vpop.eup %3132 }
0x1574   :  { %v2391_v15 = vpack.c.bf16 %v3133_v13, %v3131_v12 }
0x1576   :  { %2875 = vmatmul.mubr.msk.bf16.vlgmr.msra.gmra.mxu1 %vm82_vm0, %v2391_v15 }
0x1636   :  { %v2447_v16 = vpop.f32.mrf.mxu1 }
0x1637   :  { %v2448_v17 = vadd.f32 %v2580_v14, %v2447_v16 }
0x1638   :  { %v2876_v18 = vpop.f32.mrf.mxu1 }
0x1639   :  { %2454 = vst [vmem:[%s3775_s24] sm:$0xff] %v2448_v17 }
0x163a   :  { %v2450_v19 = vpop.f32.mrf.mxu1 }
0x163b   :  { %v2451_v20 = vadd.f32 %v2580_v14, %v2450_v19 }
0x163c   :  { %v2877_v33 = vpop.f32.mrf.mxu1 }
0x163d   :  { %2455 = vst [vmem:[%s3775_s24 + $0x8] sm:$0xff] %v2451_v20 }

</bundles_post_ra>
